<compile_context>
chip_gen: v7x
topology: tpu7x:2x2x1
jax: 0.10.0
libtpu: 0.0.40
codegen_flags: <defaults>
</compile_context>

<pallas_src>
import functools

import jax
import jax.numpy as jnp
from jax import lax
from jax.experimental import pallas as pl
from jax.experimental.pallas import tpu as pltpu


def _conv3x3_stats(x, w_ref, *, Wh, R):
    """3x3 'same' conv over a row-flattened [R = Hh*Wh, C] channels-last map.

    x     : [R, C] f32 value (already live in vregs).
    w_ref : [9*C, Cout] bf16 weights, (dy, dx, ci)-major rows.
    Returns y [R, Cout] f32 and per-image BN stats (sum, centered sum-of-squares).

    The 9 shifted taps are built from `x` with row shifts + halo masks (no VMEM
    scratch, no reload of the center tap), cast to bf16 individually, and
    contracted in ONE bf16 MXU matmul with f32 accumulation.
    """
    # Halo masks from an in-kernel iota ([R, 1] f32 0/1 values, not inputs).
    r = lax.broadcasted_iota(jnp.int32, (R, 1), 0)
    wo = r % Wh
    ml = jnp.where(wo != 0, 1.0, 0.0)         # kill dx = -1 at wo == 0
    mr = jnp.where(wo != Wh - 1, 1.0, 0.0)    # kill dx = +1 at wo == Wh-1
    mt = jnp.where(r >= Wh, 1.0, 0.0)         # kill dy = -1 at ho == 0
    mb = jnp.where(r < R - Wh, 1.0, 0.0)      # kill dy = +1 at ho == Hh-1

    def shift(a, k):
        # result[i] = a[(i + k) % R]; the wrapped rows are zeroed by the masks.
        return jnp.concatenate([a[k:], a[:k]], axis=0) if k else a

    taps = []
    for dy, mv in ((-1, mt), (0, None), (1, mb)):
        b = shift(x, dy * Wh)
        if mv is not None:
            b = b * mv                        # masks applied in f32, then cast
        taps.append((shift(b, -1) * ml).astype(jnp.bfloat16))   # dx = -1
        taps.append(b.astype(jnp.bfloat16))                     # dx =  0
        taps.append((shift(b, 1) * mr).astype(jnp.bfloat16))    # dx = +1

    cols = jnp.concatenate(taps, axis=1)                        # [R, 9C] bf16
    y = jnp.dot(cols, w_ref[...], preferred_element_type=jnp.float32)
    s = jnp.sum(y, axis=0, keepdims=True)                       # [1, Cout]
    d = y - s * (1.0 / R)                                       # centered
    q = jnp.sum(d * d, axis=0, keepdims=True)                   # [1, Cout]
    return y, s, q


def _conv1_kernel(x_ref, w_ref, y_ref, s_ref, q_ref, *, Wh, R):
    y, s, q = _conv3x3_stats(x_ref[0].astype(jnp.float32), w_ref, Wh=Wh, R=R)
    y_ref[0] = y.astype(y_ref.dtype)
    s_ref[0] = s
    q_ref[0] = q


def _bn_relu_conv_kernel(y1_ref, sc_ref, sh_ref, w_ref, y_ref, s_ref, q_ref, *, Wh, R):
    h = jnp.maximum(y1_ref[0].astype(jnp.float32) * sc_ref[...] + sh_ref[...], 0.0)
    y, s, q = _conv3x3_stats(h, w_ref, Wh=Wh, R=R)
    y_ref[0] = y.astype(y_ref.dtype)
    s_ref[0] = s
    q_ref[0] = q


def _bn_relu_kernel(y2_ref, sc_ref, sh_ref, o_ref):
    o_ref[0] = jnp.maximum(y2_ref[0].astype(jnp.float32) * sc_ref[...] + sh_ref[...],
                           0.0).astype(o_ref.dtype)


def down_pallas(x, params, *, eps=1e-5):
    """x: [N, Cin, H, W] (NCHW, like PyTorch).  Returns [N, Cout, H//2, W//2] f32."""
    w1, g1, b1, w2, g2, b2 = params
    N, Cin, H, W = x.shape
    assert H % 2 == 0 and W % 2 == 0
    Hh, Wh = H // 2, W // 2
    R = Hh * Wh
    Cmid = w1.shape[0]
    Cout = w2.shape[0]

    # 2x2 max-pool as a fused elementwise max on the NCHW input, so the layout
    # transpose only touches the pooled (1/4-size) tensor and no stride-2
    # quarter copies are materialized in HBM.
    # TODO(synk): in a fully-NHWC network the bracketing transposes disappear
    # and the pool folds into the conv1 kernel.
    p = jnp.maximum(jnp.maximum(x[:, :, 0::2, 0::2], x[:, :, 0::2, 1::2]),
                    jnp.maximum(x[:, :, 1::2, 0::2], x[:, :, 1::2, 1::2]))
    pooled = jnp.transpose(p, (0, 2, 3, 1)).reshape(N, R, Cin).astype(jnp.bfloat16)

    # conv weights [Cout, Cin, 3, 3] -> [9*Cin, Cout] (tap-major, channel-minor)
    w1m = jnp.transpose(w1, (2, 3, 1, 0)).reshape(9 * Cin, Cmid).astype(jnp.bfloat16)
    w2m = jnp.transpose(w2, (2, 3, 1, 0)).reshape(9 * Cmid, Cout).astype(jnp.bfloat16)

    count = float(N * R)
    cparams = pltpu.CompilerParams(dimension_semantics=("parallel",))

    def per_image(rows, ch):
        return pl.BlockSpec((1, rows, ch), lambda n: (n, 0, 0))

    # Grid-invariant operands: constant index map -> the pipeline does not
    # re-fetch them per grid step (effectively single-buffered).
    def shared(shape):
        return pl.BlockSpec(shape, lambda n: (0, 0))

    def conv_cost(cin, cout):
        return pl.CostEstimate(
            flops=2 * N * R * 9 * cin * cout,
            transcendentals=0,
            bytes_accessed=2 * (N * R * (cin + cout) + 9 * cin * cout) + 8 * N * cout)

    # ---- call 1: conv1 (+ per-image BN1 statistics) ----
    y1, s1, q1 = pl.pallas_call(
        functools.partial(_conv1_kernel, Wh=Wh, R=R),
        grid=(N,),
        in_specs=[per_image(R, Cin), shared((9 * Cin, Cmid))],
        out_specs=(per_image(R, Cmid), per_image(1, Cmid), per_image(1, Cmid)),
        out_shape=(jax.ShapeDtypeStruct((N, R, Cmid), jnp.bfloat16),
                   jax.ShapeDtypeStruct((N, 1, Cmid), jnp.float32),
                   jax.ShapeDtypeStruct((N, 1, Cmid), jnp.float32)),
        compiler_params=cparams,
        cost_estimate=conv_cost(Cin, Cmid),
    )(pooled, w1m)

    def fold_bn(s, q, gamma, beta):
        # tiny O(N*C) combine of per-image (sum, centered sum-of-squares) into
        # fused BN scale / shift (training-mode batch statistics).
        s = s[:, 0, :]                       # [N, C] per-image sums
        q = q[:, 0, :]                       # [N, C] per-image centered SSQ
        mean = jnp.sum(s, axis=0) / count
        m_n = s / R                          # per-image means
        var = (jnp.sum(q, axis=0) + R * jnp.sum((m_n - mean) ** 2, axis=0)) / count
        scale = gamma.astype(jnp.float32) * lax.rsqrt(var + eps)
        shift = beta.astype(jnp.float32) - mean * scale
        return scale.reshape(1, -1), shift.reshape(1, -1)

    sc1, sh1 = fold_bn(s1, q1, g1, b1)

    # ---- call 2: BN1 + ReLU + conv2 (+ per-image BN2 statistics) ----
    y2, s2, q2 = pl.pallas_call(
        functools.partial(_bn_relu_conv_kernel, Wh=Wh, R=R),
        grid=(N,),
        in_specs=[per_image(R, Cmid), shared((1, Cmid)), shared((1, Cmid)),
                  shared((9 * Cmid, Cout))],
        out_specs=(per_image(R, Cout), per_image(1, Cout), per_image(1, Cout)),
        out_shape=(jax.ShapeDtypeStruct((N, R, Cout), jnp.bfloat16),
                   jax.ShapeDtypeStruct((N, 1, Cout), jnp.float32),
                   jax.ShapeDtypeStruct((N, 1, Cout), jnp.float32)),
        compiler_params=cparams,
        cost_estimate=conv_cost(Cmid, Cout),
    )(y1, sc1, sh1, w2m)

    sc2, sh2 = fold_bn(s2, q2, g2, b2)

    # ---- call 3: BN2 + ReLU ----
    out_flat = pl.pallas_call(
        _bn_relu_kernel,
        grid=(N,),
        in_specs=[per_image(R, Cout), shared((1, Cout)), shared((1, Cout))],
        out_specs=per_image(R, Cout),
        out_shape=jax.ShapeDtypeStruct((N, R, Cout), jnp.float32),
        compiler_params=cparams,
        cost_estimate=pl.CostEstimate(flops=2 * N * R * Cout, transcendentals=0,
                                      bytes_accessed=6 * N * R * Cout),
    )(y2, sc2, sh2)

    out = out_flat.reshape(N, Hh, Wh, Cout)
    return jnp.transpose(out, (0, 3, 1, 2))


def ref_down(x, w1, g1, b1, w2, g2, b2, eps=1e-5):
    """Pure-JAX f32 reference mirroring the PyTorch module (training-mode BN)."""
    p = lax.reduce_window(x, -jnp.inf, lax.max,
                          window_dimensions=(1, 1, 2, 2),
                          window_strides=(1, 1, 2, 2), padding='VALID')

    def block(h, w, g, b):
        y = lax.conv_general_dilated(h, w, window_strides=(1, 1), padding='SAME',
                                     dimension_numbers=('NCHW', 'OIHW', 'NCHW'))
        m = jnp.mean(y, axis=(0, 2, 3), keepdims=True)
        v = jnp.mean((y - m) ** 2, axis=(0, 2, 3), keepdims=True)
        y = (y - m) * lax.rsqrt(v + eps) * g.reshape(1, -1, 1, 1) + b.reshape(1, -1, 1, 1)
        return jnp.maximum(y, 0.0)

    return block(block(p, w1, g1, b1), w2, g2, b2)


if __name__ == "__main__":
    key = jax.random.PRNGKey(0)
    ks = jax.random.split(key, 6)

    N, Cin, H, Wd = 2, 4, 16, 16
    Cout = 8  # DoubleConv with mid_channels=None -> mid == out

    # Round test inputs onto the bf16 grid so the f32 reference and the bf16-fed
    # MXU kernel see identical operands; the residual differences are the bf16
    # storage of the inter-stage activations and the bf16 re-round before conv2.
    def q(a):
        return a.astype(jnp.bfloat16).astype(jnp.float32)

    x = q(jax.random.normal(ks[0], (N, Cin, H, Wd), jnp.float32))
    w1 = q(0.2 * jax.random.normal(ks[1], (Cout, Cin, 3, 3), jnp.float32))
    w2 = q(0.2 * jax.random.normal(ks[2], (Cout, Cout, 3, 3), jnp.float32))
    g1 = 1.0 + 0.1 * jax.random.normal(ks[3], (Cout,), jnp.float32)
    b1 = 0.1 * jax.random.normal(ks[4], (Cout,), jnp.float32)
    g2 = 1.0 + 0.1 * jax.random.normal(ks[5], (Cout,), jnp.float32)
    b2 = jnp.zeros((Cout,), jnp.float32)

    down = jax.jit(down_pallas)
    out = down(x, (w1, g1, b1, w2, g2, b2))
    out = jax.block_until_ready(out)

    ref = ref_down(x, w1, g1, b1, w2, g2, b2)
    assert out.shape == (N, Cout, H // 2, Wd // 2), out.shape
    err = float(jnp.max(jnp.abs(out - ref)))
    assert err < 3e-2, f"max abs err {err}"

    print("KERNEL_OK")
</pallas_src>

<mosaic_0001>
module attributes {stable_mosaic.version = 11 : i64} {
  func.func @_conv1_kernel(%arg0: i32, %arg1: memref<1x64x4xbf16, #tpu.memory_space<vmem>>, %arg2: memref<36x8xbf16, #tpu.memory_space<vmem>>, %arg3: memref<1x64x8xbf16, #tpu.memory_space<vmem>>, %arg4: memref<1x1x8xf32, #tpu.memory_space<vmem>>, %arg5: memref<1x1x8xf32, #tpu.memory_space<vmem>>) attributes {dimension_semantics = [#tpu.dimension_semantics<parallel>], iteration_bounds = array<i64: 2>, scalar_prefetch = 0 : i64, scratch_operands = 0 : i64, tpu.core_type = #tpu.core_type<tc>, window_params = [{transform_indices = @transform_0, window_bounds = array<i64: 1, 64, 4>}, {pipeline_mode = #tpu.pipeline_mode<synchronous>, transform_indices = @transform_1, window_bounds = array<i64: 36, 8>}, {transform_indices = @transform_2, window_bounds = array<i64: 1, 64, 8>}, {transform_indices = @transform_3, window_bounds = array<i64: 1, 1, 8>}, {transform_indices = @transform_4, window_bounds = array<i64: 1, 1, 8>}]} {
    %c0 = arith.constant 0 : index
    %c0_0 = arith.constant 0 : index
    %c0_1 = arith.constant 0 : index
    %0 = vector.load %arg1[%c0, %c0_0, %c0_1] : memref<1x64x4xbf16, #tpu.memory_space<vmem>>, vector<1x64x4xbf16>
    %1 = vector.shape_cast %0 : vector<1x64x4xbf16> to vector<64x4xbf16>
    %2 = arith.extf %1 : vector<64x4xbf16> to vector<64x4xf32>
    %3 = tpu.iota {dimensions = array<i32: 0>} : vector<64x1xi32>
    %c8_i32 = arith.constant 8 : i32
    %c0_i32 = arith.constant 0 : i32
    %4 = arith.cmpi eq, %c8_i32, %c0_i32 : i32
    %c1_i32 = arith.constant 1 : i32
    %5 = arith.select %4, %c1_i32, %c8_i32 : i32
    %6 = vector.broadcast %5 : i32 to vector<64x1xi32>
    %7 = arith.remsi %3, %6 : vector<64x1xi32>
    %c0_i32_2 = arith.constant 0 : i32
    %8 = vector.broadcast %c0_i32_2 : i32 to vector<64x1xi32>
    %9 = arith.cmpi ne, %7, %8 : vector<64x1xi32>
    %c0_i32_3 = arith.constant 0 : i32
    %10 = vector.broadcast %c0_i32_3 : i32 to vector<64x1xi32>
    %11 = arith.cmpi slt, %7, %10 : vector<64x1xi32>
    %c0_i32_4 = arith.constant 0 : i32
    %12 = arith.cmpi slt, %5, %c0_i32_4 : i32
    %13 = vector.broadcast %12 : i1 to vector<64x1xi1>
    %14 = vector.broadcast %13 : vector<64x1xi1> to vector<64x1xi1>
    %15 = arith.xori %11, %14 : vector<64x1xi1>
    %16 = arith.andi %15, %9 : vector<64x1xi1>
    %17 = vector.broadcast %5 : i32 to vector<64x1xi32>
    %18 = arith.addi %7, %17 : vector<64x1xi32>
    %19 = arith.select %16, %18, %7 : vector<64x1xi1>, vector<64x1xi32>
    %c0_i32_5 = arith.constant 0 : i32
    %20 = vector.broadcast %c0_i32_5 : i32 to vector<64x1xi32>
    %21 = arith.cmpi ne, %19, %20 : vector<64x1xi32>
    %cst = arith.constant 1.000000e+00 : f32
    %cst_6 = arith.constant 0.000000e+00 : f32
    %22 = vector.broadcast %cst : f32 to vector<64x1xf32>
    %23 = vector.broadcast %cst_6 : f32 to vector<64x1xf32>
    %24 = arith.select %21, %22, %23 : vector<64x1xi1>, vector<64x1xf32>
    %c7_i32 = arith.constant 7 : i32
    %25 = vector.broadcast %c7_i32 : i32 to vector<64x1xi32>
    %26 = arith.cmpi ne, %19, %25 : vector<64x1xi32>
    %cst_7 = arith.constant 1.000000e+00 : f32
    %cst_8 = arith.constant 0.000000e+00 : f32
    %27 = vector.broadcast %cst_7 : f32 to vector<64x1xf32>
    %28 = vector.broadcast %cst_8 : f32 to vector<64x1xf32>
    %29 = arith.select %26, %27, %28 : vector<64x1xi1>, vector<64x1xf32>
    %c8_i32_9 = arith.constant 8 : i32
    %30 = vector.broadcast %c8_i32_9 : i32 to vector<64x1xi32>
    %31 = arith.cmpi sge, %3, %30 : vector<64x1xi32>
    %cst_10 = arith.constant 1.000000e+00 : f32
    %cst_11 = arith.constant 0.000000e+00 : f32
    %32 = vector.broadcast %cst_10 : f32 to vector<64x1xf32>
    %33 = vector.broadcast %cst_11 : f32 to vector<64x1xf32>
    %34 = arith.select %31, %32, %33 : vector<64x1xi1>, vector<64x1xf32>
    %c56_i32 = arith.constant 56 : i32
    %35 = vector.broadcast %c56_i32 : i32 to vector<64x1xi32>
    %36 = arith.cmpi slt, %3, %35 : vector<64x1xi32>
    %cst_12 = arith.constant 1.000000e+00 : f32
    %cst_13 = arith.constant 0.000000e+00 : f32
    %37 = vector.broadcast %cst_12 : f32 to vector<64x1xf32>
    %38 = vector.broadcast %cst_13 : f32 to vector<64x1xf32>
    %39 = arith.select %36, %37, %38 : vector<64x1xi1>, vector<64x1xf32>
    %40 = vector.extract_strided_slice %2 {offsets = [56, 0], sizes = [8, 4], strides = [1, 1]} : vector<64x4xf32> to vector<8x4xf32>
    %41 = vector.extract_strided_slice %2 {offsets = [0, 0], sizes = [56, 4], strides = [1, 1]} : vector<64x4xf32> to vector<56x4xf32>
    %42 = tpu.concatenate %40, %41 in 0 : vector<8x4xf32>, vector<56x4xf32> -> vector<64x4xf32>
    %43 = vector.broadcast %34 : vector<64x1xf32> to vector<64x4xf32>
    %44 = arith.mulf %42, %43 : vector<64x4xf32>
    %45 = vector.extract_strided_slice %44 {offsets = [63, 0], sizes = [1, 4], strides = [1, 1]} : vector<64x4xf32> to vector<1x4xf32>
    %46 = vector.extract_strided_slice %44 {offsets = [0, 0], sizes = [63, 4], strides = [1, 1]} : vector<64x4xf32> to vector<63x4xf32>
    %47 = tpu.concatenate %45, %46 in 0 : vector<1x4xf32>, vector<63x4xf32> -> vector<64x4xf32>
    %48 = vector.broadcast %24 : vector<64x1xf32> to vector<64x4xf32>
    %49 = arith.mulf %47, %48 : vector<64x4xf32>
    %50 = arith.truncf %49 : vector<64x4xf32> to vector<64x4xbf16>
    %51 = arith.truncf %44 : vector<64x4xf32> to vector<64x4xbf16>
    %52 = vector.extract_strided_slice %44 {offsets = [1, 0], sizes = [63, 4], strides = [1, 1]} : vector<64x4xf32> to vector<63x4xf32>
    %53 = vector.extract_strided_slice %44 {offsets = [0, 0], sizes = [1, 4], strides = [1, 1]} : vector<64x4xf32> to vector<1x4xf32>
    %54 = tpu.concatenate %52, %53 in 0 : vector<63x4xf32>, vector<1x4xf32> -> vector<64x4xf32>
    %55 = vector.broadcast %29 : vector<64x1xf32> to vector<64x4xf32>
    %56 = arith.mulf %54, %55 : vector<64x4xf32>
    %57 = arith.truncf %56 : vector<64x4xf32> to vector<64x4xbf16>
    %58 = vector.extract_strided_slice %2 {offsets = [63, 0], sizes = [1, 4], strides = [1, 1]} : vector<64x4xf32> to vector<1x4xf32>
    %59 = vector.extract_strided_slice %2 {offsets = [0, 0], sizes = [63, 4], strides = [1, 1]} : vector<64x4xf32> to vector<63x4xf32>
    %60 = tpu.concatenate %58, %59 in 0 : vector<1x4xf32>, vector<63x4xf32> -> vector<64x4xf32>
    %61 = vector.broadcast %24 : vector<64x1xf32> to vector<64x4xf32>
    %62 = arith.mulf %60, %61 : vector<64x4xf32>
    %63 = arith.truncf %62 : vector<64x4xf32> to vector<64x4xbf16>
    %64 = arith.truncf %2 : vector<64x4xf32> to vector<64x4xbf16>
    %65 = vector.extract_strided_slice %2 {offsets = [1, 0], sizes = [63, 4], strides = [1, 1]} : vector<64x4xf32> to vector<63x4xf32>
    %66 = vector.extract_strided_slice %2 {offsets = [0, 0], sizes = [1, 4], strides = [1, 1]} : vector<64x4xf32> to vector<1x4xf32>
    %67 = tpu.concatenate %65, %66 in 0 : vector<63x4xf32>, vector<1x4xf32> -> vector<64x4xf32>
    %68 = vector.broadcast %29 : vector<64x1xf32> to vector<64x4xf32>
    %69 = arith.mulf %67, %68 : vector<64x4xf32>
    %70 = arith.truncf %69 : vector<64x4xf32> to vector<64x4xbf16>
    %71 = vector.extract_strided_slice %2 {offsets = [8, 0], sizes = [56, 4], strides = [1, 1]} : vector<64x4xf32> to vector<56x4xf32>
    %72 = vector.extract_strided_slice %2 {offsets = [0, 0], sizes = [8, 4], strides = [1, 1]} : vector<64x4xf32> to vector<8x4xf32>
    %73 = tpu.concatenate %71, %72 in 0 : vector<56x4xf32>, vector<8x4xf32> -> vector<64x4xf32>
    %74 = vector.broadcast %39 : vector<64x1xf32> to vector<64x4xf32>
    %75 = arith.mulf %73, %74 : vector<64x4xf32>
    %76 = vector.extract_strided_slice %75 {offsets = [63, 0], sizes = [1, 4], strides = [1, 1]} : vector<64x4xf32> to vector<1x4xf32>
    %77 = vector.extract_strided_slice %75 {offsets = [0, 0], sizes = [63, 4], strides = [1, 1]} : vector<64x4xf32> to vector<63x4xf32>
    %78 = tpu.concatenate %76, %77 in 0 : vector<1x4xf32>, vector<63x4xf32> -> vector<64x4xf32>
    %79 = vector.broadcast %24 : vector<64x1xf32> to vector<64x4xf32>
    %80 = arith.mulf %78, %79 : vector<64x4xf32>
    %81 = arith.truncf %80 : vector<64x4xf32> to vector<64x4xbf16>
    %82 = arith.truncf %75 : vector<64x4xf32> to vector<64x4xbf16>
    %83 = vector.extract_strided_slice %75 {offsets = [1, 0], sizes = [63, 4], strides = [1, 1]} : vector<64x4xf32> to vector<63x4xf32>
    %84 = vector.extract_strided_slice %75 {offsets = [0, 0], sizes = [1, 4], strides = [1, 1]} : vector<64x4xf32> to vector<1x4xf32>
    %85 = tpu.concatenate %83, %84 in 0 : vector<63x4xf32>, vector<1x4xf32> -> vector<64x4xf32>
    %86 = vector.broadcast %29 : vector<64x1xf32> to vector<64x4xf32>
    %87 = arith.mulf %85, %86 : vector<64x4xf32>
    %88 = arith.truncf %87 : vector<64x4xf32> to vector<64x4xbf16>
    %89 = tpu.concatenate %50, %51, %57, %63, %64, %70, %81, %82, %88 in 1 : vector<64x4xbf16>, vector<64x4xbf16>, vector<64x4xbf16>, vector<64x4xbf16>, vector<64x4xbf16>, vector<64x4xbf16>, vector<64x4xbf16>, vector<64x4xbf16>, vector<64x4xbf16> -> vector<64x36xbf16>
    %c0_14 = arith.constant 0 : index
    %c0_15 = arith.constant 0 : index
    %90 = vector.load %arg2[%c0_14, %c0_15] : memref<36x8xbf16, #tpu.memory_space<vmem>>, vector<36x8xbf16>
    %cst_16 = arith.constant dense<0.000000e+00> : vector<64x8xf32>
    %91 = tpu.matmul %89, %90, %cst_16 {dimension_numbers = #tpu.dot_dimension_numbers<[1], [0], [0], [1], [0, 0, 1, 1], [], []>} : vector<64x36xbf16>, vector<36x8xbf16>, vector<64x8xf32> -> vector<64x8xf32>
    %cst_17 = arith.constant dense<0.000000e+00> : vector<8xf32>
    %92 = vector.multi_reduction <add>, %91, %cst_17 [0] : vector<64x8xf32> to vector<8xf32>
    %93 = vector.shape_cast %92 : vector<8xf32> to vector<1x8xf32>
    %cst_18 = arith.constant 1.562500e-02 : f32
    %94 = vector.broadcast %cst_18 : f32 to vector<1x8xf32>
    %95 = arith.mulf %93, %94 : vector<1x8xf32>
    %96 = vector.broadcast %95 : vector<1x8xf32> to vector<64x8xf32>
    %97 = arith.subf %91, %96 : vector<64x8xf32>
    %98 = arith.mulf %97, %97 : vector<64x8xf32>
    %cst_19 = arith.constant dense<0.000000e+00> : vector<8xf32>
    %99 = vector.multi_reduction <add>, %98, %cst_19 [0] : vector<64x8xf32> to vector<8xf32>
    %100 = vector.shape_cast %99 : vector<8xf32> to vector<1x8xf32>
    %101 = arith.truncf %91 : vector<64x8xf32> to vector<64x8xbf16>
    %c0_20 = arith.constant 0 : index
    %c0_21 = arith.constant 0 : index
    %c0_22 = arith.constant 0 : index
    %102 = vector.load %arg3[%c0_20, %c0_21, %c0_22] : memref<1x64x8xbf16, #tpu.memory_space<vmem>>, vector<1x64x8xbf16>
    %103 = vector.shape_cast %102 : vector<1x64x8xbf16> to vector<64x8xbf16>
    %104 = vector.shape_cast %101 : vector<64x8xbf16> to vector<1x64x8xbf16>
    tpu.vector_store %arg3[%c0_20, %c0_21, %c0_22], %104 {strides = array<i32>} : memref<1x64x8xbf16, #tpu.memory_space<vmem>>, vector<1x64x8xbf16>,
    %c0_23 = arith.constant 0 : index
    %c0_24 = arith.constant 0 : index
    %c0_25 = arith.constant 0 : index
    %105 = vector.load %arg4[%c0_23, %c0_24, %c0_25] : memref<1x1x8xf32, #tpu.memory_space<vmem>>, vector<1x1x8xf32>
    %106 = vector.shape_cast %105 : vector<1x1x8xf32> to vector<1x8xf32>
    %107 = vector.shape_cast %93 : vector<1x8xf32> to vector<1x1x8xf32>
    tpu.vector_store %arg4[%c0_23, %c0_24, %c0_25], %107 {strides = array<i32>} : memref<1x1x8xf32, #tpu.memory_space<vmem>>, vector<1x1x8xf32>,
    %c0_26 = arith.constant 0 : index
    %c0_27 = arith.constant 0 : index
    %c0_28 = arith.constant 0 : index
    %108 = vector.load %arg5[%c0_26, %c0_27, %c0_28] : memref<1x1x8xf32, #tpu.memory_space<vmem>>, vector<1x1x8xf32>
    %109 = vector.shape_cast %108 : vector<1x1x8xf32> to vector<1x8xf32>
    %110 = vector.shape_cast %100 : vector<1x8xf32> to vector<1x1x8xf32>
    tpu.vector_store %arg5[%c0_26, %c0_27, %c0_28], %110 {strides = array<i32>} : memref<1x1x8xf32, #tpu.memory_space<vmem>>, vector<1x1x8xf32>,
    return
  }
  func.func @transform_0(%arg0: i32) -> (i32, i32, i32) {
    %c0_i32 = arith.constant 0 : i32
    %c0_i32_0 = arith.constant 0 : i32
    %c0_i32_1 = arith.constant 0 : i32
    return %arg0, %c0_i32, %c0_i32_0 : i32, i32, i32
  }
  func.func @transform_1(%arg0: i32) -> (i32, i32) {
    %c0_i32 = arith.constant 0 : i32
    %c0_i32_0 = arith.constant 0 : i32
    %c0_i32_1 = arith.constant 0 : i32
    return %c0_i32, %c0_i32_0 : i32, i32
  }
  func.func @transform_2(%arg0: i32) -> (i32, i32, i32) {
    %c0_i32 = arith.constant 0 : i32
    %c0_i32_0 = arith.constant 0 : i32
    %c0_i32_1 = arith.constant 0 : i32
    return %arg0, %c0_i32, %c0_i32_0 : i32, i32, i32
  }
  func.func @transform_3(%arg0: i32) -> (i32, i32, i32) {
    %c0_i32 = arith.constant 0 : i32
    %c0_i32_0 = arith.constant 0 : i32
    %c0_i32_1 = arith.constant 0 : i32
    return %arg0, %c0_i32, %c0_i32_0 : i32, i32, i32
  }
  func.func @transform_4(%arg0: i32) -> (i32, i32, i32) {
    %c0_i32 = arith.constant 0 : i32
    %c0_i32_0 = arith.constant 0 : i32
    %c0_i32_1 = arith.constant 0 : i32
    return %arg0, %c0_i32, %c0_i32_0 : i32, i32, i32
  }
}

module attributes {stable_mosaic.version = 11 : i64} {
  func.func @_bn_relu_kernel(%arg0: i32, %arg1: memref<1x64x8xbf16, #tpu.memory_space<vmem>>, %arg2: memref<1x8xf32, #tpu.memory_space<vmem>>, %arg3: memref<1x8xf32, #tpu.memory_space<vmem>>, %arg4: memref<1x64x8xf32, #tpu.memory_space<vmem>>) attributes {dimension_semantics = [#tpu.dimension_semantics<parallel>], iteration_bounds = array<i64: 2>, scalar_prefetch = 0 : i64, scratch_operands = 0 : i64, tpu.core_type = #tpu.core_type<tc>, window_params = [{transform_indices = @transform_0, window_bounds = array<i64: 1, 64, 8>}, {pipeline_mode = #tpu.pipeline_mode<synchronous>, transform_indices = @transform_1, window_bounds = array<i64: 1, 8>}, {pipeline_mode = #tpu.pipeline_mode<synchronous>, transform_indices = @transform_2, window_bounds = array<i64: 1, 8>}, {transform_indices = @transform_3, window_bounds = array<i64: 1, 64, 8>}]} {
    %c0 = arith.constant 0 : index
    %c0_0 = arith.constant 0 : index
    %c0_1 = arith.constant 0 : index
    %0 = vector.load %arg1[%c0, %c0_0, %c0_1] : memref<1x64x8xbf16, #tpu.memory_space<vmem>>, vector<1x64x8xbf16>
    %1 = vector.shape_cast %0 : vector<1x64x8xbf16> to vector<64x8xbf16>
    %2 = arith.extf %1 : vector<64x8xbf16> to vector<64x8xf32>
    %c0_2 = arith.constant 0 : index
    %c0_3 = arith.constant 0 : index
    %3 = vector.load %arg2[%c0_2, %c0_3] : memref<1x8xf32, #tpu.memory_space<vmem>>, vector<1x8xf32>
    %4 = vector.broadcast %3 : vector<1x8xf32> to vector<64x8xf32>
    %5 = arith.mulf %2, %4 : vector<64x8xf32>
    %c0_4 = arith.constant 0 : index
    %c0_5 = arith.constant 0 : index
    %6 = vector.load %arg3[%c0_4, %c0_5] : memref<1x8xf32, #tpu.memory_space<vmem>>, vector<1x8xf32>
    %7 = vector.broadcast %6 : vector<1x8xf32> to vector<64x8xf32>
    %8 = arith.addf %5, %7 : vector<64x8xf32>
    %cst = arith.constant 0.000000e+00 : f32
    %9 = vector.broadcast %cst : f32 to vector<64x8xf32>
    %10 = arith.maximumf %8, %9 : vector<64x8xf32>
    %c0_6 = arith.constant 0 : index
    %c0_7 = arith.constant 0 : index
    %c0_8 = arith.constant 0 : index
    %11 = vector.load %arg4[%c0_6, %c0_7, %c0_8] : memref<1x64x8xf32, #tpu.memory_space<vmem>>, vector<1x64x8xf32>
    %12 = vector.shape_cast %11 : vector<1x64x8xf32> to vector<64x8xf32>
    %13 = vector.shape_cast %10 : vector<64x8xf32> to vector<1x64x8xf32>
    tpu.vector_store %arg4[%c0_6, %c0_7, %c0_8], %13 {strides = array<i32>} : memref<1x64x8xf32, #tpu.memory_space<vmem>>, vector<1x64x8xf32>,
    return
  }
  func.func @transform_0(%arg0: i32) -> (i32, i32, i32) {
    %c0_i32 = arith.constant 0 : i32
    %c0_i32_0 = arith.constant 0 : i32
    %c0_i32_1 = arith.constant 0 : i32
    return %arg0, %c0_i32, %c0_i32_0 : i32, i32, i32
  }
  func.func @transform_1(%arg0: i32) -> (i32, i32) {
    %c0_i32 = arith.constant 0 : i32
    %c0_i32_0 = arith.constant 0 : i32
    %c0_i32_1 = arith.constant 0 : i32
    return %c0_i32, %c0_i32_0 : i32, i32
  }
  func.func @transform_2(%arg0: i32) -> (i32, i32) {
    %c0_i32 = arith.constant 0 : i32
    %c0_i32_0 = arith.constant 0 : i32
    %c0_i32_1 = arith.constant 0 : i32
    return %c0_i32, %c0_i32_0 : i32, i32
  }
  func.func @transform_3(%arg0: i32) -> (i32, i32, i32) {
    %c0_i32 = arith.constant 0 : i32
    %c0_i32_0 = arith.constant 0 : i32
    %c0_i32_1 = arith.constant 0 : i32
    return %arg0, %c0_i32, %c0_i32_0 : i32, i32, i32
  }
}

module attributes {stable_mosaic.version = 11 : i64} {
  func.func @_bn_relu_conv_kernel(%arg0: i32, %arg1: memref<1x64x8xbf16, #tpu.memory_space<vmem>>, %arg2: memref<1x8xf32, #tpu.memory_space<vmem>>, %arg3: memref<1x8xf32, #tpu.memory_space<vmem>>, %arg4: memref<72x8xbf16, #tpu.memory_space<vmem>>, %arg5: memref<1x64x8xbf16, #tpu.memory_space<vmem>>, %arg6: memref<1x1x8xf32, #tpu.memory_space<vmem>>, %arg7: memref<1x1x8xf32, #tpu.memory_space<vmem>>) attributes {dimension_semantics = [#tpu.dimension_semantics<parallel>], iteration_bounds = array<i64: 2>, scalar_prefetch = 0 : i64, scratch_operands = 0 : i64, tpu.core_type = #tpu.core_type<tc>, window_params = [{transform_indices = @transform_0, window_bounds = array<i64: 1, 64, 8>}, {pipeline_mode = #tpu.pipeline_mode<synchronous>, transform_indices = @transform_1, window_bounds = array<i64: 1, 8>}, {pipeline_mode = #tpu.pipeline_mode<synchronous>, transform_indices = @transform_2, window_bounds = array<i64: 1, 8>}, {pipeline_mode = #tpu.pipeline_mode<synchronous>, transform_indices = @transform_3, window_bounds = array<i64: 72, 8>}, {transform_indices = @transform_4, window_bounds = array<i64: 1, 64, 8>}, {transform_indices = @transform_5, window_bounds = array<i64: 1, 1, 8>}, {transform_indices = @transform_6, window_bounds = array<i64: 1, 1, 8>}]} {
    %c0 = arith.constant 0 : index
    %c0_0 = arith.constant 0 : index
    %c0_1 = arith.constant 0 : index
    %0 = vector.load %arg1[%c0, %c0_0, %c0_1] : memref<1x64x8xbf16, #tpu.memory_space<vmem>>, vector<1x64x8xbf16>
    %1 = vector.shape_cast %0 : vector<1x64x8xbf16> to vector<64x8xbf16>
    %2 = arith.extf %1 : vector<64x8xbf16> to vector<64x8xf32>
    %c0_2 = arith.constant 0 : index
    %c0_3 = arith.constant 0 : index
    %3 = vector.load %arg2[%c0_2, %c0_3] : memref<1x8xf32, #tpu.memory_space<vmem>>, vector<1x8xf32>
    %4 = vector.broadcast %3 : vector<1x8xf32> to vector<64x8xf32>
    %5 = arith.mulf %2, %4 : vector<64x8xf32>
    %c0_4 = arith.constant 0 : index
    %c0_5 = arith.constant 0 : index
    %6 = vector.load %arg3[%c0_4, %c0_5] : memref<1x8xf32, #tpu.memory_space<vmem>>, vector<1x8xf32>
    %7 = vector.broadcast %6 : vector<1x8xf32> to vector<64x8xf32>
    %8 = arith.addf %5, %7 : vector<64x8xf32>
    %cst = arith.constant 0.000000e+00 : f32
    %9 = vector.broadcast %cst : f32 to vector<64x8xf32>
    %10 = arith.maximumf %8, %9 : vector<64x8xf32>
    %11 = tpu.iota {dimensions = array<i32: 0>} : vector<64x1xi32>
    %c8_i32 = arith.constant 8 : i32
    %c0_i32 = arith.constant 0 : i32
    %12 = arith.cmpi eq, %c8_i32, %c0_i32 : i32
    %c1_i32 = arith.constant 1 : i32
    %13 = arith.select %12, %c1_i32, %c8_i32 : i32
    %14 = vector.broadcast %13 : i32 to vector<64x1xi32>
    %15 = arith.remsi %11, %14 : vector<64x1xi32>
    %c0_i32_6 = arith.constant 0 : i32
    %16 = vector.broadcast %c0_i32_6 : i32 to vector<64x1xi32>
    %17 = arith.cmpi ne, %15, %16 : vector<64x1xi32>
    %c0_i32_7 = arith.constant 0 : i32
    %18 = vector.broadcast %c0_i32_7 : i32 to vector<64x1xi32>
    %19 = arith.cmpi slt, %15, %18 : vector<64x1xi32>
    %c0_i32_8 = arith.constant 0 : i32
    %20 = arith.cmpi slt, %13, %c0_i32_8 : i32
    %21 = vector.broadcast %20 : i1 to vector<64x1xi1>
    %22 = vector.broadcast %21 : vector<64x1xi1> to vector<64x1xi1>
    %23 = arith.xori %19, %22 : vector<64x1xi1>
    %24 = arith.andi %23, %17 : vector<64x1xi1>
    %25 = vector.broadcast %13 : i32 to vector<64x1xi32>
    %26 = arith.addi %15, %25 : vector<64x1xi32>
    %27 = arith.select %24, %26, %15 : vector<64x1xi1>, vector<64x1xi32>
    %c0_i32_9 = arith.constant 0 : i32
    %28 = vector.broadcast %c0_i32_9 : i32 to vector<64x1xi32>
    %29 = arith.cmpi ne, %27, %28 : vector<64x1xi32>
    %cst_10 = arith.constant 1.000000e+00 : f32
    %cst_11 = arith.constant 0.000000e+00 : f32
    %30 = vector.broadcast %cst_10 : f32 to vector<64x1xf32>
    %31 = vector.broadcast %cst_11 : f32 to vector<64x1xf32>
    %32 = arith.select %29, %30, %31 : vector<64x1xi1>, vector<64x1xf32>
    %c7_i32 = arith.constant 7 : i32
    %33 = vector.broadcast %c7_i32 : i32 to vector<64x1xi32>
    %34 = arith.cmpi ne, %27, %33 : vector<64x1xi32>
    %cst_12 = arith.constant 1.000000e+00 : f32
    %cst_13 = arith.constant 0.000000e+00 : f32
    %35 = vector.broadcast %cst_12 : f32 to vector<64x1xf32>
    %36 = vector.broadcast %cst_13 : f32 to vector<64x1xf32>
    %37 = arith.select %34, %35, %36 : vector<64x1xi1>, vector<64x1xf32>
    %c8_i32_14 = arith.constant 8 : i32
    %38 = vector.broadcast %c8_i32_14 : i32 to vector<64x1xi32>
    %39 = arith.cmpi sge, %11, %38 : vector<64x1xi32>
    %cst_15 = arith.constant 1.000000e+00 : f32
    %cst_16 = arith.constant 0.000000e+00 : f32
    %40 = vector.broadcast %cst_15 : f32 to vector<64x1xf32>
    %41 = vector.broadcast %cst_16 : f32 to vector<64x1xf32>
    %42 = arith.select %39, %40, %41 : vector<64x1xi1>, vector<64x1xf32>
    %c56_i32 = arith.constant 56 : i32
    %43 = vector.broadcast %c56_i32 : i32 to vector<64x1xi32>
    %44 = arith.cmpi slt, %11, %43 : vector<64x1xi32>
    %cst_17 = arith.constant 1.000000e+00 : f32
    %cst_18 = arith.constant 0.000000e+00 : f32
    %45 = vector.broadcast %cst_17 : f32 to vector<64x1xf32>
    %46 = vector.broadcast %cst_18 : f32 to vector<64x1xf32>
    %47 = arith.select %44, %45, %46 : vector<64x1xi1>, vector<64x1xf32>
    %48 = vector.extract_strided_slice %10 {offsets = [56, 0], sizes = [8, 8], strides = [1, 1]} : vector<64x8xf32> to vector<8x8xf32>
    %49 = vector.extract_strided_slice %10 {offsets = [0, 0], sizes = [56, 8], strides = [1, 1]} : vector<64x8xf32> to vector<56x8xf32>
    %50 = tpu.concatenate %48, %49 in 0 : vector<8x8xf32>, vector<56x8xf32> -> vector<64x8xf32>
    %51 = vector.broadcast %42 : vector<64x1xf32> to vector<64x8xf32>
    %52 = arith.mulf %50, %51 : vector<64x8xf32>
    %53 = vector.extract_strided_slice %52 {offsets = [63, 0], sizes = [1, 8], strides = [1, 1]} : vector<64x8xf32> to vector<1x8xf32>
    %54 = vector.extract_strided_slice %52 {offsets = [0, 0], sizes = [63, 8], strides = [1, 1]} : vector<64x8xf32> to vector<63x8xf32>
    %55 = tpu.concatenate %53, %54 in 0 : vector<1x8xf32>, vector<63x8xf32> -> vector<64x8xf32>
    %56 = vector.broadcast %32 : vector<64x1xf32> to vector<64x8xf32>
    %57 = arith.mulf %55, %56 : vector<64x8xf32>
    %58 = arith.truncf %57 : vector<64x8xf32> to vector<64x8xbf16>
    %59 = arith.truncf %52 : vector<64x8xf32> to vector<64x8xbf16>
    %60 = vector.extract_strided_slice %52 {offsets = [1, 0], sizes = [63, 8], strides = [1, 1]} : vector<64x8xf32> to vector<63x8xf32>
    %61 = vector.extract_strided_slice %52 {offsets = [0, 0], sizes = [1, 8], strides = [1, 1]} : vector<64x8xf32> to vector<1x8xf32>
    %62 = tpu.concatenate %60, %61 in 0 : vector<63x8xf32>, vector<1x8xf32> -> vector<64x8xf32>
    %63 = vector.broadcast %37 : vector<64x1xf32> to vector<64x8xf32>
    %64 = arith.mulf %62, %63 : vector<64x8xf32>
    %65 = arith.truncf %64 : vector<64x8xf32> to vector<64x8xbf16>
    %66 = vector.extract_strided_slice %10 {offsets = [63, 0], sizes = [1, 8], strides = [1, 1]} : vector<64x8xf32> to vector<1x8xf32>
    %67 = vector.extract_strided_slice %10 {offsets = [0, 0], sizes = [63, 8], strides = [1, 1]} : vector<64x8xf32> to vector<63x8xf32>
    %68 = tpu.concatenate %66, %67 in 0 : vector<1x8xf32>, vector<63x8xf32> -> vector<64x8xf32>
    %69 = vector.broadcast %32 : vector<64x1xf32> to vector<64x8xf32>
    %70 = arith.mulf %68, %69 : vector<64x8xf32>
    %71 = arith.truncf %70 : vector<64x8xf32> to vector<64x8xbf16>
    %72 = arith.truncf %10 : vector<64x8xf32> to vector<64x8xbf16>
    %73 = vector.extract_strided_slice %10 {offsets = [1, 0], sizes = [63, 8], strides = [1, 1]} : vector<64x8xf32> to vector<63x8xf32>
    %74 = vector.extract_strided_slice %10 {offsets = [0, 0], sizes = [1, 8], strides = [1, 1]} : vector<64x8xf32> to vector<1x8xf32>
    %75 = tpu.concatenate %73, %74 in 0 : vector<63x8xf32>, vector<1x8xf32> -> vector<64x8xf32>
    %76 = vector.broadcast %37 : vector<64x1xf32> to vector<64x8xf32>
    %77 = arith.mulf %75, %76 : vector<64x8xf32>
    %78 = arith.truncf %77 : vector<64x8xf32> to vector<64x8xbf16>
    %79 = vector.extract_strided_slice %10 {offsets = [8, 0], sizes = [56, 8], strides = [1, 1]} : vector<64x8xf32> to vector<56x8xf32>
    %80 = vector.extract_strided_slice %10 {offsets = [0, 0], sizes = [8, 8], strides = [1, 1]} : vector<64x8xf32> to vector<8x8xf32>
    %81 = tpu.concatenate %79, %80 in 0 : vector<56x8xf32>, vector<8x8xf32> -> vector<64x8xf32>
    %82 = vector.broadcast %47 : vector<64x1xf32> to vector<64x8xf32>
    %83 = arith.mulf %81, %82 : vector<64x8xf32>
    %84 = vector.extract_strided_slice %83 {offsets = [63, 0], sizes = [1, 8], strides = [1, 1]} : vector<64x8xf32> to vector<1x8xf32>
    %85 = vector.extract_strided_slice %83 {offsets = [0, 0], sizes = [63, 8], strides = [1, 1]} : vector<64x8xf32> to vector<63x8xf32>
    %86 = tpu.concatenate %84, %85 in 0 : vector<1x8xf32>, vector<63x8xf32> -> vector<64x8xf32>
    %87 = vector.broadcast %32 : vector<64x1xf32> to vector<64x8xf32>
    %88 = arith.mulf %86, %87 : vector<64x8xf32>
    %89 = arith.truncf %88 : vector<64x8xf32> to vector<64x8xbf16>
    %90 = arith.truncf %83 : vector<64x8xf32> to vector<64x8xbf16>
    %91 = vector.extract_strided_slice %83 {offsets = [1, 0], sizes = [63, 8], strides = [1, 1]} : vector<64x8xf32> to vector<63x8xf32>
    %92 = vector.extract_strided_slice %83 {offsets = [0, 0], sizes = [1, 8], strides = [1, 1]} : vector<64x8xf32> to vector<1x8xf32>
    %93 = tpu.concatenate %91, %92 in 0 : vector<63x8xf32>, vector<1x8xf32> -> vector<64x8xf32>
    %94 = vector.broadcast %37 : vector<64x1xf32> to vector<64x8xf32>
    %95 = arith.mulf %93, %94 : vector<64x8xf32>
    %96 = arith.truncf %95 : vector<64x8xf32> to vector<64x8xbf16>
    %97 = tpu.concatenate %58, %59, %65, %71, %72, %78, %89, %90, %96 in 1 : vector<64x8xbf16>, vector<64x8xbf16>, vector<64x8xbf16>, vector<64x8xbf16>, vector<64x8xbf16>, vector<64x8xbf16>, vector<64x8xbf16>, vector<64x8xbf16>, vector<64x8xbf16> -> vector<64x72xbf16>
    %c0_19 = arith.constant 0 : index
    %c0_20 = arith.constant 0 : index
    %98 = vector.load %arg4[%c0_19, %c0_20] : memref<72x8xbf16, #tpu.memory_space<vmem>>, vector<72x8xbf16>
    %cst_21 = arith.constant dense<0.000000e+00> : vector<64x8xf32>
    %99 = tpu.matmul %97, %98, %cst_21 {dimension_numbers = #tpu.dot_dimension_numbers<[1], [0], [0], [1], [0, 0, 1, 1], [], []>} : vector<64x72xbf16>, vector<72x8xbf16>, vector<64x8xf32> -> vector<64x8xf32>
    %cst_22 = arith.constant dense<0.000000e+00> : vector<8xf32>
    %100 = vector.multi_reduction <add>, %99, %cst_22 [0] : vector<64x8xf32> to vector<8xf32>
    %101 = vector.shape_cast %100 : vector<8xf32> to vector<1x8xf32>
    %cst_23 = arith.constant 1.562500e-02 : f32
    %102 = vector.broadcast %cst_23 : f32 to vector<1x8xf32>
    %103 = arith.mulf %101, %102 : vector<1x8xf32>
    %104 = vector.broadcast %103 : vector<1x8xf32> to vector<64x8xf32>
    %105 = arith.subf %99, %104 : vector<64x8xf32>
    %106 = arith.mulf %105, %105 : vector<64x8xf32>
    %cst_24 = arith.constant dense<0.000000e+00> : vector<8xf32>
    %107 = vector.multi_reduction <add>, %106, %cst_24 [0] : vector<64x8xf32> to vector<8xf32>
    %108 = vector.shape_cast %107 : vector<8xf32> to vector<1x8xf32>
    %109 = arith.truncf %99 : vector<64x8xf32> to vector<64x8xbf16>
    %c0_25 = arith.constant 0 : index
    %c0_26 = arith.constant 0 : index
    %c0_27 = arith.constant 0 : index
    %110 = vector.load %arg5[%c0_25, %c0_26, %c0_27] : memref<1x64x8xbf16, #tpu.memory_space<vmem>>, vector<1x64x8xbf16>
    %111 = vector.shape_cast %110 : vector<1x64x8xbf16> to vector<64x8xbf16>
    %112 = vector.shape_cast %109 : vector<64x8xbf16> to vector<1x64x8xbf16>
    tpu.vector_store %arg5[%c0_25, %c0_26, %c0_27], %112 {strides = array<i32>} : memref<1x64x8xbf16, #tpu.memory_space<vmem>>, vector<1x64x8xbf16>,
    %c0_28 = arith.constant 0 : index
    %c0_29 = arith.constant 0 : index
    %c0_30 = arith.constant 0 : index
    %113 = vector.load %arg6[%c0_28, %c0_29, %c0_30] : memref<1x1x8xf32, #tpu.memory_space<vmem>>, vector<1x1x8xf32>
    %114 = vector.shape_cast %113 : vector<1x1x8xf32> to vector<1x8xf32>
    %115 = vector.shape_cast %101 : vector<1x8xf32> to vector<1x1x8xf32>
    tpu.vector_store %arg6[%c0_28, %c0_29, %c0_30], %115 {strides = array<i32>} : memref<1x1x8xf32, #tpu.memory_space<vmem>>, vector<1x1x8xf32>,
    %c0_31 = arith.constant 0 : index
    %c0_32 = arith.constant 0 : index
    %c0_33 = arith.constant 0 : index
    %116 = vector.load %arg7[%c0_31, %c0_32, %c0_33] : memref<1x1x8xf32, #tpu.memory_space<vmem>>, vector<1x1x8xf32>
    %117 = vector.shape_cast %116 : vector<1x1x8xf32> to vector<1x8xf32>
    %118 = vector.shape_cast %108 : vector<1x8xf32> to vector<1x1x8xf32>
    tpu.vector_store %arg7[%c0_31, %c0_32, %c0_33], %118 {strides = array<i32>} : memref<1x1x8xf32, #tpu.memory_space<vmem>>, vector<1x1x8xf32>,
    return
  }
  func.func @transform_0(%arg0: i32) -> (i32, i32, i32) {
    %c0_i32 = arith.constant 0 : i32
    %c0_i32_0 = arith.constant 0 : i32
    %c0_i32_1 = arith.constant 0 : i32
    return %arg0, %c0_i32, %c0_i32_0 : i32, i32, i32
  }
  func.func @transform_1(%arg0: i32) -> (i32, i32) {
    %c0_i32 = arith.constant 0 : i32
    %c0_i32_0 = arith.constant 0 : i32
    %c0_i32_1 = arith.constant 0 : i32
    return %c0_i32, %c0_i32_0 : i32, i32
  }
  func.func @transform_2(%arg0: i32) -> (i32, i32) {
    %c0_i32 = arith.constant 0 : i32
    %c0_i32_0 = arith.constant 0 : i32
    %c0_i32_1 = arith.constant 0 : i32
    return %c0_i32, %c0_i32_0 : i32, i32
  }
  func.func @transform_3(%arg0: i32) -> (i32, i32) {
    %c0_i32 = arith.constant 0 : i32
    %c0_i32_0 = arith.constant 0 : i32
    %c0_i32_1 = arith.constant 0 : i32
    return %c0_i32, %c0_i32_0 : i32, i32
  }
  func.func @transform_4(%arg0: i32) -> (i32, i32, i32) {
    %c0_i32 = arith.constant 0 : i32
    %c0_i32_0 = arith.constant 0 : i32
    %c0_i32_1 = arith.constant 0 : i32
    return %arg0, %c0_i32, %c0_i32_0 : i32, i32, i32
  }
  func.func @transform_5(%arg0: i32) -> (i32, i32, i32) {
    %c0_i32 = arith.constant 0 : i32
    %c0_i32_0 = arith.constant 0 : i32
    %c0_i32_1 = arith.constant 0 : i32
    return %arg0, %c0_i32, %c0_i32_0 : i32, i32, i32
  }
  func.func @transform_6(%arg0: i32) -> (i32, i32, i32) {
    %c0_i32 = arith.constant 0 : i32
    %c0_i32_0 = arith.constant 0 : i32
    %c0_i32_1 = arith.constant 0 : i32
    return %arg0, %c0_i32, %c0_i32_0 : i32, i32, i32
  }
}

</mosaic_0001>

<bundles_post_ra>
// kernel: down_pallas.5
= control target key start
LH: loop header
LB: loop body
LE: loop exit
PB: predicated region body
PF: predicated region fallthrough
CT: control target
= control target key end

     0   :  { %s359_s12 = smov 0   ;;  %s394_s0 = inlined_call_operand.vmem [shape: bf16[2,64,8], index: 0, kind: input, shape index: {}]   ;;  %s395_s1 = inlined_call_operand.vmem [shape: f32[1,8], index: 1, kind: input, shape index: {}]   ;;  %s396_s2 = inlined_call_operand.vmem [shape: f32[1,8], index: 2, kind: input, shape index: {}]   ;;  %s397_s3 = inlined_call_operand.vmem [shape: f32[2,64,8], index: 3, kind: output, shape index: {}]  }
   0x1 LB: > { %s289_s13 = sadd.s32 4294967295, %s337_s12   ;;  %p293_p0 = scmp.ge.s32.totalorder %s337_s12, 1  ;;  %s337_s12 = sphi %s359_s12, %s13_s12  }
   0x2   : > { %p137_p1 = scmp.lt.s32.totalorder %s337_s12, 3 }
   0x4   : > { %p138_p2 = pnand %p293_p0, %p137_p1 }
   0x5   : > { %p161_p3 = scmp.lt.s32.totalorder (!%p138_p2), %s289_s13, 1  ;;  %v298_v0 = vld [vmem:[%s395_s1] ss:$0 sm:$0xff] (!%p138_p2)  ;;  %vm225_vm0 = vcmask (!%p138_p2), 64512  }
   0x6   : > { %141 = sbr.rel (%p138_p2) target bundleno = 29 (0x1d), region = 32  ;;  %v299_v9 = vld [vmem:[%s396_s2] ss:$0 sm:$0xff] (!%p138_p2) }
   0xd   : > { %s399_s13 = smov (!%p161_p3, %s289_s13), 1 }
   0xe   : > { %s302_s14 = sshll.u32 %s399_s13, 5  ;;  %s303_s22 = sshll.u32 %s399_s13, 6 }
   0xf   : > { %s165_s17 = scalar_lea.vmem %s394_s0, %s302_s14  ;;  %s170_s25 = scalar_lea.vmem %s397_s3, %s303_s22 }
  0x10   : > { %v305_v1 = vld [vmem:[%s165_s17] sm:$0xff]   ;;  %v320_v2 = vld [vmem:[%s165_s17 + $0x8] sm:$0xff]   ;;  %v321_v3 = vld [vmem:[%s165_s17 + $0x10] sm:$0xff]  }
  0x11   : > { %v306_v4 = vunpack.c.l.bf16 %v305_v1  ;;  %v307_v5 = vunpack.c.h.bf16 %v305_v1  ;;  %v310_v6 = vunpack.c.l.bf16 %v320_v2  ;;  %v311_v7 = vunpack.c.h.bf16 %v320_v2  ;;  %v322_v8 = vld [vmem:[%s165_s17 + $0x18] sm:$0xff]  }
  0x12   : > { %v314_v10 = vunpack.c.l.bf16 %v321_v3  ;;  %v315_v11 = vunpack.c.h.bf16 %v321_v3  ;;  %v318_v12 = vunpack.c.l.bf16 %v322_v8  ;;  %v319_v13 = vunpack.c.h.bf16 %v322_v8 }
  0x13   : > { %v194_v14 = vmul.f32 %v306_v4, %v298_v0  ;;  %v195_v15 = vmul.f32 %v307_v5, %v298_v0  ;;  %v196_v16 = vmul.f32 %v310_v6, %v298_v0  ;;  %v197_v17 = vmul.f32 %v311_v7, %v298_v0 }
  0x14   : > { %v198_v18 = vmul.f32 %v314_v10, %v298_v0  ;;  %v199_v19 = vmul.f32 %v315_v11, %v298_v0  ;;  %v200_v20 = vmul.f32 %v318_v12, %v298_v0  ;;  %v201_v21 = vmul.f32 %v319_v13, %v298_v0 }
  0x15   : > { %v209_v22 = vadd.f32 %v299_v9, %v194_v14  ;;  %v210_v23 = vadd.f32 %v299_v9, %v195_v15  ;;  %v211_v24 = vadd.f32 %v299_v9, %v196_v16  ;;  %v212_v25 = vadd.f32 %v299_v9, %v197_v17 }
  0x16   : > { %v213_v26 = vadd.f32 %v299_v9, %v198_v18  ;;  %v214_v27 = vadd.f32 %v299_v9, %v199_v19  ;;  %v215_v28 = vadd.f32 %v299_v9, %v200_v20  ;;  %v216_v29 = vadd.f32 %v299_v9, %v201_v21 }
  0x17   : > { %v217_v30 = vmax.f32 %v209_v22, 0.0  ;;  %v218_v31 = vmax.f32 %v210_v23, 0.0  ;;  %v219_v32 = vmax.f32 %v211_v24, 0.0  ;;  %v220_v33 = vmax.f32 %v212_v25, 0.0 }
  0x18   : > { %v221_v34 = vmax.f32 %v213_v26, 0.0  ;;  %v222_v35 = vmax.f32 %v214_v27, 0.0  ;;  %v223_v36 = vmax.f32 %v215_v28, 0.0  ;;  %v224_v37 = vmax.f32 %v216_v29, 0.0 }
  0x19   : > { %226 = vst.msk [vmem:[%s170_s25] sm:$0xff] %vm225_vm0, %v217_v30  ;;  %227 = vst.msk [vmem:[%s170_s25 + $0x8] sm:$0xff] %vm225_vm0, %v218_v31 }
  0x1a   : > { %228 = vst.msk [vmem:[%s170_s25 + $0x10] sm:$0xff] %vm225_vm0, %v219_v32  ;;  %229 = vst.msk [vmem:[%s170_s25 + $0x18] sm:$0xff] %vm225_vm0, %v220_v33 }
  0x1b   : > { %230 = vst.msk [vmem:[%s170_s25 + $0x20] sm:$0xff] %vm225_vm0, %v221_v34  ;;  %231 = vst.msk [vmem:[%s170_s25 + $0x28] sm:$0xff] %vm225_vm0, %v222_v35 }
  0x1c   : > { %232 = vst.msk [vmem:[%s170_s25 + $0x30] sm:$0xff] %vm225_vm0, %v223_v36  ;;  %233 = vst.msk [vmem:[%s170_s25 + $0x38] sm:$0xff] %vm225_vm0, %v224_v37 }
  0x1d PF: > { %s13_s12 = sadd.s32 1, %s337_s12  }
  0x1e   : > { %p10_p4 = scmp.ge.s32.totalorder %s13_s12, 4  }
  0x20   :  { %12 = sbr.rel (!%p10_p4) target bundleno = 1 (0x1), region = 62 }

// kernel: down_pallas.3
= control target key start
LH: loop header
LB: loop body
LE: loop exit
PB: predicated region body
PF: predicated region fallthrough
CT: control target
= control target key end

     0   :  { %s1311_s15 = smov 0   ;;  %s1744_s0 = inlined_call_operand.vmem [shape: bf16[2,64,4], index: 0, kind: input, shape index: {}]   ;;  %s1745_s1 = inlined_call_operand.vmem [shape: bf16[36,8], index: 1, kind: input, shape index: {}]   ;;  %s1746_s2 = inlined_call_operand.vmem [shape: bf16[2,64,8], index: 2, kind: output, shape index: {0}]   ;;  %s1747_s3 = inlined_call_operand.vmem [shape: f32[2,1,8], index: 3, kind: output, shape index: {1}]   ;;  %s1748_s4 = inlined_call_operand.vmem [shape: f32[2,1,8], index: 4, kind: output, shape index: {2}]  }
   0x1 LB: > { %s1167_s16 = sadd.s32 4294967295, %s1275_s15   ;;  %p1171_p0 = scmp.ge.s32.totalorder %s1275_s15, 1  ;;  %s1275_s15 = sphi %s1311_s15, %s15_s15  }
   0x2   : > { %p167_p1 = scmp.lt.s32.totalorder %s1275_s15, 3 }
   0x4   : > { %p168_p2 = pnand %p1171_p0, %p167_p1 }
   0x5   : > { %p199_p3 = scmp.lt.s32.totalorder (!%p168_p2), %s1167_s16, 1  ;;  %v232_v0 = vlaneseq (!%p168_p2)  ;;  %vm459_vm0 = vcmask (!%p168_p2), 1046528   ;;  %vm419_vm1 = vcmask (!%p168_p2), 1040384   ;;  %s1277_s21 = smov (!%p168_p2), 4   ;;  %v1279_v30 = vmov (!%p168_p2), 0.0   ;;  %v1266_v55 = vld [vmem:[%s1745_s1] sm:$0xff] (!%p168_p2)  }
   0x6   : > { %171 = sbr.rel (%p168_p2) target bundleno = 467 (0x1d3), region = 28  ;;  %s1278_s22 = smov (!%p168_p2), 16   ;;  %1220 = vmatprep.subr.bf16.mxu0 (!%p168_p2), %v1266_v55  ;;  %1234 = vmatprep.subr.bf16.mxu1 (!%p168_p2), %v1266_v55 }
   0x7   : > { %v1321_v1 = vshrl.u32 (!%p168_p2), %v232_v0, 7  ;;  %s1280_s23 = smov (!%p168_p2), 8   ;;  %1221 = vmatpush3.bf16.msra.mxu0 (!%p168_p2), %v1266_v55  ;;  %1237 = vmatpush3.bf16.msra.mxu1 (!%p168_p2), %v1266_v55  ;;  %s1281_s26 = smov (!%p168_p2), 12  }
   0x8   : > { %s1282_s29 = smov (!%p168_p2), 20   ;;  %s1283_s30 = smov (!%p168_p2), 24  }
   0x9   : > { %v235_v2 = vadd.s32 (!%p168_p2), 16, %v1321_v1  ;;  %v236_v3 = vadd.s32 (!%p168_p2), 24, %v1321_v1  ;;  %v1334_v4 = vadd.s32 (!%p168_p2), 8, %v1321_v1  ;;  %v245_v5 = vand.u32 (!%p168_p2), 7, %v1321_v1  ;;  %s1284_s5 = smov (!%p168_p2), 28   ;;  %s1285_s6 = smov (!%p168_p2), 32  }
   0xa   : > { %v1338_v6 = vadd.s32 (!%p168_p2), 32, %v1321_v1  ;;  %v1354_v19 = vadd.s32 (!%p168_p2), 40, %v1321_v1 }
   0xb   : > { %v259_v17 = vand.u32 (!%p168_p2), 7, %v235_v2  ;;  %v266_v27 = vand.u32 (!%p168_p2), 7, %v236_v3  ;;  %v252_v47 = vand.u32 (!%p168_p2), 7, %v1334_v4  ;;  %vm337_vm6 = vcmp.ne.s32.totalorder (!%p168_p2), %v245_v5, 0 }
   0xc   : > { %v1417_v50 = vsel (!%p168_p2), %vm337_vm6, 1.0, %v1279_v30  ;;  %vm353_vm8 = vcmp.ne.s32.totalorder (!%p168_p2), %v245_v5, 7  ;;  %v280_v55 = vand.u32 (!%p168_p2), 7, %v1354_v19  ;;  %vm816_vm6 = vcmask (!%p168_p2), 130048  }
   0xd   : > { %s1750_s16 = smov (!%p199_p3, %s1167_s16), 1  ;;  %vm355_vm2 = vcmp.ne.s32.totalorder %v259_v17, 7  ;;  %vm339_vm3 = vcmp.ne.s32.totalorder %v259_v17, 0  ;;  %vm356_vm4 = vcmp.ne.s32.totalorder %v266_v27, 7  ;;  %vm340_vm5 = vcmp.ne.s32.totalorder %v266_v27, 0 }
   0xe   : > { %s1203_s17 = sshll.u32 %s1750_s16, 5  ;;  %v1373_v31 = vsel %vm355_vm2, 1.0, %v1279_v30  ;;  %v1380_v33 = vsel %vm356_vm4, 1.0, %v1279_v30  ;;  %v347_v36 = vsel %vm339_vm3, 1.0, %v1279_v30  ;;  %v1391_v38 = vsel %vm340_vm5, 1.0, %v1279_v30  ;;  %s211_s14 = scalar_lea.vmem %s1747_s3, %s1750_s16 }
   0xf   : > { %s1330_s20 = scalar_lea.vmem %s1744_s0, %s1203_s17  ;;  %vm338_vm7 = vcmp.ne.s32.totalorder %v252_v47, 0  ;;  %vm354_vm9 = vcmp.ne.s32.totalorder %v252_v47, 7  ;;  %v361_v62 = vsel %vm353_vm8, 1.0, %v1279_v30  ;;  %v240_v47 = vadd.s32 56, %v1321_v1  ;;  %s1697_s11 = scalar_lea.vmem %s1746_s2, %s1203_s17 }
  0x10   : > { %v217_v7 = vld [vmem:[%s1330_s20 + $0x4] sm:$0xf]  ;;  %v218_v8 = vld [vmem:[%s1330_s20 + $0x8] sm:$0xf]  ;;  %v1343_v9 = vld [vmem:[%s1330_s20 + $0xc] sm:$0xf]  ;;  %s214_s19 = scalar_lea.vmem %s1748_s4, %s1750_s16 }
  0x11   : > { %v226_v10 = vunpack.c.l.bf16 %v218_v8  ;;  %v1345_v11 = vcombine.low %v217_v7, %v218_v8  ;;  %v225_v12 = vunpack.c.l.bf16 %v217_v7  ;;  %v227_v13 = vunpack.c.l.bf16 %v1343_v9  ;;  %v216_v14 = vld [vmem:[%s1330_s20] sm:$0xf]  ;;  %v1351_v18 = vld [vmem:[%s1330_s20 + $0x1c] sm:$0xf]  ;;  %v1402_v41 = vld [vmem:[%s1330_s20 + $0x10] sm:$0xf] }
  0x12   : > { %v1183_v15 = vcombine.low %v218_v8, %v1343_v9  ;;  %v1182_v16 = vcombine.low %v216_v14, %v217_v7  ;;  %v224_v23 = vunpack.c.l.bf16 %v216_v14  ;;  %v1370_v29 = vunpack.c.l.bf16 %v1351_v18 }
  0x13   : > { %v425_v20 = vrot.slane %v226_v10, 7  ;;  %v465_v21 = vrot.slane %v226_v10, 1  ;;  %679 = vrot.lane.b32.xlu0 %v1345_v11, %s1277_s21  ;;  %v1358_v22 = vrot.slane %v225_v12, 1  ;;  %v1360_v24 = vrot.slane %v225_v12, 7  ;;  %v1267_v10 = vld [vmem:[%s1745_s1 + $0x8] sm:$0xff]  }
  0x14   : > { %v1362_v25 = vrot.slane %v227_v13, 7  ;;  %v467_v26 = vrot.slane %v227_v13, 1  ;;  %731 = vrot.lane.b32.xlu1 %v1183_v15, %s1278_s22  ;;  %v1385_v35 = vmul.f32 0.0, %v1370_v29  ;;  %v1404_v42 = vmul.f32 0.0, %v224_v23  ;;  %1222 = vmatprep.subr.bf16.mxu0 %v1267_v10 }
  0x15   : > { %v1367_v28 = vsel %vm459_vm0, %v1358_v22, %v465_v21  ;;  %v1395_v39 = vsel %vm419_vm1, %v1360_v24, %v425_v20  ;;  %v1413_v48 = vrot.slane %v224_v23, 7  ;;  %v1420_v51 = vrot.slane %v1370_v29, 7  ;;  %1223 = vmatpush3.bf16.msra.mxu0 %v1267_v10  ;;  %1235 = vmatprep.subr.bf16.mxu1 %v1267_v10 }
  0x16   : > { %v1376_v32 = vsel %vm459_vm0, %v465_v21, %v467_v26  ;;  %v487_v34 = vmul.f32 %v1367_v28, %v1373_v31  ;;  %v1399_v40 = vsel %vm419_vm1, %v425_v20, %v1362_v25  ;;  %v455_v43 = vpack.c.bf16 %v224_v23, %v1385_v35  ;;  %1238 = vmatpush3.bf16.msra.mxu1 %v1267_v10 }
  0x17   : > { %729 = vrot.lane.b32.xlu0 %v1182_v16, %s1278_s22  ;;  %v488_v37 = vmul.f32 %v1376_v32, %v1380_v33  ;;  %v532_v44 = vmul.f32 %v1395_v39, %v347_v36  ;;  %v533_v45 = vmul.f32 %v1399_v40, %v1391_v38  ;;  %v228_v52 = vunpack.c.l.bf16 %v1402_v41 }
  0x18   : > { %v424_v53 = vsel %vm419_vm1, %v1413_v48, %v1360_v24  ;;  %v569_v54 = vmul.f32 %v1376_v32, %v1373_v31  ;;  %v1435_v56 = vsel %vm338_vm7, 1.0, %v1279_v30  ;;  %v529_v57 = vsel %vm419_vm1, %v1420_v51, %v1413_v48 }
  0x19   : > { %v494_v46 = vpack.c.bf16 %v488_v37, %v487_v34  ;;  %v539_v49 = vpack.c.bf16 %v533_v45, %v532_v44  ;;  %v1440_v58 = vmul.f32 %v424_v53, %v347_v36  ;;  %v469_v59 = vrot.slane %v228_v52, 1 }
  0x1a   : > { %v530_v60 = vmul.f32 %v529_v57, %v1417_v50  ;;  %v531_v61 = vmul.f32 %v424_v53, %v1435_v56  ;;  %v362_v0 = vsel %vm354_vm9, 1.0, %v1279_v30  ;;  %v1449_v2 = vrot.slane %v224_v23, 1  ;;  %v1473_v23 = vld [vmem:[%s1330_s20 + $0x14] sm:$0xf] }
  0x1b   : > { %677 = vrot.lane.b32.xlu0 %v455_v43, %s1277_s21  ;;  %691 = vrot.lane.b32.xlu1 %v494_v46, %s1280_s23  ;;  %v1446_v63 = vsel %vm459_vm0, %v467_v26, %v469_v59  ;;  %v460_v3 = vrot.slane %v1385_v35, 1  ;;  %v568_v7 = vmul.f32 %v1367_v28, %v362_v0  ;;  %v588_v8 = vrot.slane %v1404_v42, 7  ;;  %v1491_v46 = vld [vmem:[%s1330_s20 + $0x18] sm:$0xf] }
  0x1c   : > { %v538_v4 = vpack.c.bf16 %v531_v61, %v530_v60  ;;  %v570_v5 = vmul.f32 %v1446_v63, %v1380_v33  ;;  %v464_v12 = vsel %vm459_vm0, %v1449_v2, %v1358_v22  ;;  %v621_v14 = vmul.f32 %v1395_v39, %v1435_v56 }
  0x1d   : > { %v462_v13 = vsel %vm459_vm0, %v460_v3, %v1449_v2  ;;  %v1469_v15 = vrot.slane %v228_v52, 7  ;;  %v567_v17 = vmul.f32 %v464_v12, %v361_v62  ;;  %v486_v21 = vmul.f32 %v464_v12, %v362_v0 }
  0x1e   : > { %v576_v16 = vpack.c.bf16 %v570_v5, %v569_v54  ;;  %v485_v20 = vmul.f32 %v462_v13, %v361_v62  ;;  %v619_v26 = vsel %vm419_vm1, %v588_v8, %v1360_v24  ;;  %v622_v34 = vmul.f32 %v1399_v40, %v347_v36 }
  0x1f   : > { %703 = vrot.lane.b32.xlu1 %v539_v49, %s1281_s26  ;;  %701 = vrot.lane.b32.xlu0 %v538_v4, %s1281_s26  ;;  %v1482_v27 = vsel %vm419_vm1, %v1362_v25, %v1469_v15  ;;  %v239_v37 = vadd.s32 48, %v1321_v1  ;;  %v575_v43 = vpack.c.bf16 %v568_v7, %v567_v17  ;;  %v620_v45 = vmul.f32 %v619_v26, %v1417_v50 }
  0x20   : > { %v493_v44 = vpack.c.bf16 %v486_v21, %v485_v20  ;;  %v623_v24 = vmul.f32 %v1482_v27, %v1391_v38  ;;  %v229_v25 = vunpack.c.l.bf16 %v1473_v23  ;;  %v230_v52 = vunpack.c.l.bf16 %v1491_v46 }
  0x21   : > { %v628_v36 = vpack.c.bf16 %v621_v14, %v620_v45  ;;  %v273_v53 = vand.u32 7, %v1338_v6  ;;  %v287_v57 = vand.u32 7, %v239_v37  ;;  %v294_v60 = vand.u32 7, %v240_v47 }
  0x22   : > { %v471_v49 = vrot.slane %v229_v25, 1  ;;  %v629_v54 = vpack.c.bf16 %v623_v24, %v622_v34  ;;  %v661_v1 = vmul.f32 %v1367_v28, %v361_v62  ;;  %v662_v61 = vmul.f32 %v1376_v32, %v362_v0 }
  0x23   : > { %743 = vrot.lane.b32.xlu1 %v576_v16, %s1282_s29  ;;  %741 = vrot.lane.b32.xlu0 %v575_v43, %s1282_s29  ;;  %v1506_v5 = vrot.slane %v230_v52, 1  ;;  %vm357_vm10 = vcmp.ne.s32.totalorder %v273_v53, 7  ;;  %v1177_v6 = vcombine.low %v1343_v9, %v1402_v41  ;;  %vm358_vm11 = vcmp.ne.s32.totalorder %v280_v55, 7 }
  0x24   : > { %v1504_v4 = vsel %vm459_vm0, %v469_v59, %v471_v49  ;;  %vm359_vm12 = vcmp.ne.s32.totalorder %v287_v57, 7  ;;  %v663_v19 = vmul.f32 %v1446_v63, %v1373_v31  ;;  %vm360_vm13 = vcmp.ne.s32.totalorder %v294_v60, 7 }
  0x25   : > { %v669_v28 = vpack.c.bf16 %v662_v61, %v661_v1  ;;  %v664_v32 = vmul.f32 %v1504_v4, %v1380_v33  ;;  %v410_v59 = vrot.slane %v230_v52, 7  ;;  %v1518_v62 = vsel %vm357_vm10, 1.0, %v1279_v30 }
  0x26   : > { %v1521_v9 = vsel %vm358_vm11, 1.0, %v1279_v30  ;;  %v1524_v0 = vsel %vm359_vm12, 1.0, %v1279_v30  ;;  %v1528_v31 = vsel %vm459_vm0, %v471_v49, %v1506_v5  ;;  %v431_v7 = vrot.slane %v229_v25, 7 }
  0x27   : > { %689 = vrot.lane.b32.xlu1 %v493_v44, %s1280_s23  ;;  %753 = vrot.lane.b32.xlu0 %v628_v36, %s1283_s30  ;;  %v484_v33 = vsel %vm459_vm0, %v1506_v5, %v460_v3  ;;  %vm341_vm14 = vcmp.ne.s32.totalorder %v273_v53, 0  ;;  %vm342_vm15 = vcmp.ne.s32.totalorder %v280_v55, 0  ;;  %v420_v10 = vrot.slane %v1385_v35, 7 }
  0x28   : > { %v489_v12 = vmul.f32 %v1446_v63, %v1518_v62  ;;  %vm343_vm2 = vcmp.ne.s32.totalorder %v287_v57, 0  ;;  %v670_v13 = vpack.c.bf16 %v664_v32, %v663_v19  ;;  %v490_v14 = vmul.f32 %v1504_v4, %v1521_v9 }
  0x29   : > { %v491_v16 = vmul.f32 %v1528_v31, %v1524_v0  ;;  %vm344_vm3 = vcmp.ne.s32.totalorder %v294_v60, 0  ;;  %v349_v17 = vsel %vm341_vm14, 1.0, %v1279_v30  ;;  %v350_v35 = vsel %vm342_vm15, 1.0, %v1279_v30 }
  0x2a   : > { %v432_v63 = vsel %vm419_vm1, %v1469_v15, %v431_v7  ;;  %v1554_v20 = vcombine.low %v1473_v23, %v1491_v46  ;;  %v351_v21 = vsel %vm343_vm2, 1.0, %v1279_v30  ;;  %v433_v26 = vsel %vm419_vm1, %v431_v7, %v410_v59 }
  0x2b   : > { %755 = vrot.lane.b32.xlu1 %v629_v54, %s1283_s30  ;;  %765 = vrot.lane.b32.xlu0 %v1345_v11, %s1284_s5  ;;  %v1532_v11 = vsel %vm360_vm13, 1.0, %v1279_v30  ;;  %v352_v34 = vsel %vm344_vm3, 1.0, %v1279_v30  ;;  %v520_v37 = vsel %vm419_vm1, %v410_v59, %v1420_v51  ;;  %v495_v43 = vpack.c.bf16 %v490_v14, %v489_v12 }
  0x2c   : > { %v492_v3 = vmul.f32 %v484_v33, %v1532_v11  ;;  %v534_v15 = vmul.f32 %v1482_v27, %v349_v17  ;;  %v535_v44 = vmul.f32 %v432_v63, %v350_v35  ;;  %v536_v24 = vmul.f32 %v433_v26, %v351_v21 }
  0x2d   : > { %v1565_v25 = vmul.f32 %v1395_v39, %v1391_v38  ;;  %v442_v47 = vsel %vm419_vm1, %v410_v59, %v420_v10  ;;  %v537_v30 = vmul.f32 %v520_v37, %v352_v34  ;;  %v555_v36 = vrot.slane %v1370_v29, 1  ;;  %v1268_v39 = vld [vmem:[%s1745_s1 + $0x10] ss:$0 sps:$4 sm:$0x33]  }
  0x2e   : > { %v496_v45 = vpack.c.bf16 %v492_v3, %v491_v16  ;;  %v1572_v49 = vmul.f32 %v442_v47, %v1417_v50  ;;  %v422_v52 = vsel %vm419_vm1, %v420_v10, %v1413_v48  ;;  %v540_v54 = vpack.c.bf16 %v535_v44, %v534_v15 }
  0x2f   : > { %767 = vrot.lane.b32.xlu1 %v1177_v6, %s1284_s5  ;;  %777 = vrot.lane.b32.xlu0 %v669_v28, %s1285_s6  ;;  %v452_v53 = vpack.c.bf16 %v1565_v25, %v1440_v58  ;;  %v1579_v38 = vmul.f32 %v422_v52, %v1435_v56  ;;  %v1184_v50 = vcombine.low %v1402_v41, %v1473_v23  ;;  %vm890_vm4 = vcmask 1041408  }
  0x30   : > { %v541_v48 = vpack.c.bf16 %v537_v30, %v536_v24  ;;  %v556_v56 = vsel %vm459_vm0, %v1506_v5, %v555_v36  ;;  %v566_v57 = vsel %vm459_vm0, %v555_v36, %v1449_v2  ;;  %1240 = vmatprep.subr.msk.bf16.mxu0 %vm890_vm4, %v1268_v39  ;;  %v892_v60 = vsel %vm890_vm4, %v1268_v39, 0  ;;  %1241 = vmatprep.subr.msk.bf16.mxu1 %vm890_vm4, %v1268_v39 }
  0x31   : > { %v451_v55 = vpack.c.bf16 %v1579_v38, %v1572_v49  ;;  %v1595_v1 = vmul.f32 %v1399_v40, %v349_v17  ;;  %v1598_v41 = vmul.f32 %v1482_v27, %v350_v35  ;;  %v1600_v23 = vmul.f32 %v432_v63, %v351_v21  ;;  %1225 = vmatpush3.bf16.msra.mxu0 %v892_v60 }
  0x32   : > { %v571_v61 = vmul.f32 %v1504_v4, %v1518_v62  ;;  %v572_v2 = vmul.f32 %v1528_v31, %v1521_v9  ;;  %v1607_v5 = vmul.f32 %v433_v26, %v352_v34  ;;  %1239 = vmatpush3.bf16.msra.mxu1 %v892_v60  ;;  %v1185_v27 = vcombine.low %v1491_v46, %v1351_v18 }
  0x33   : > { %681 = vrot.lane.b32.xlu1 %v1177_v6, %s1277_s21  ;;  %779 = vrot.lane.b32.xlu0 %v670_v13, %s1285_s6  ;;  %v453_v40 = vpack.c.bf16 %v1598_v41, %v1595_v1  ;;  %v573_v6 = vmul.f32 %v556_v56, %v1524_v0  ;;  %v574_v19 = vmul.f32 %v566_v57, %v1532_v11  ;;  %v649_v10 = vrot.slane %v1404_v42, 1 }
  0x34   : > { %v454_v4 = vpack.c.bf16 %v1607_v5, %v1600_v23  ;;  %v610_v28 = vsel %vm419_vm1, %v1420_v51, %v588_v8  ;;  %v577_v32 = vpack.c.bf16 %v572_v2, %v571_v61  ;;  %v624_v59 = vmul.f32 %v432_v63, %v349_v17 }
  0x35   : > { %v625_v7 = vmul.f32 %v433_v26, %v350_v35  ;;  %v578_v18 = vpack.c.bf16 %v574_v19, %v573_v6  ;;  %v626_v46 = vmul.f32 %v520_v37, %v351_v21  ;;  %v627_v33 = vmul.f32 %v610_v28, %v352_v34 }
  0x36   : > { %v650_v51 = vsel %vm459_vm0, %v555_v36, %v649_v10  ;;  %v660_v8 = vsel %vm459_vm0, %v649_v10, %v1358_v22  ;;  %v665_v14 = vmul.f32 %v1528_v31, %v1518_v62  ;;  %v666_v16 = vmul.f32 %v556_v56, %v1521_v9 }
  0x37   : > { %683 = vrot.lane.b32.xlu1 %v1554_v20, %s1277_s21  ;;  %693 = vrot.lane.b32.xlu0 %v495_v43, %s1280_s23  ;;  %v630_v12 = vpack.c.bf16 %v625_v7, %v624_v59  ;;  %v631_v13 = vpack.c.bf16 %v627_v33, %v626_v46  ;;  %v635_v3 = vpack.c.bf16 %v1404_v42, %v1370_v29  ;;  %vm785_vm0 = vcmask 31744  }
  0x38   : > { %v667_v17 = vmul.f32 %v650_v51, %v1524_v0  ;;  %v668_v35 = vmul.f32 %v660_v8, %v1532_v11  ;;  %v671_v22 = vpack.c.bf16 %v666_v16, %v665_v14  ;;  %vm798_vm1 = vcmask 64512  }
  0x39   : > { %vm807_vm5 = vcmask 97280   ;;  %vm825_vm7 = vcmask 162816   ;;  %vm834_vm8 = vcmask 195584   ;;  %vm843_vm9 = vcmask 228352  }
  0x3a   : > { %v672_v63 = vpack.c.bf16 %v668_v35, %v667_v17  ;;  %vm852_vm10 = vcmask 261120   ;;  %vm881_vm11 = vcmask 293888   ;;  %vm1050_vm12 = vcmask 60416  }
  0x3b   : > { %695 = vrot.lane.b32.xlu1 %v496_v45, %s1280_s23  ;;  %705 = vrot.lane.b32.xlu0 %v540_v54, %s1281_s26  ;;  %vm1059_vm13 = vcmask 57344  }
  0x3f   : > { %707 = vrot.lane.b32.xlu1 %v541_v48, %s1281_s26  ;;  %733 = vrot.lane.b32.xlu0 %v1184_v50, %s1278_s22 }
  0x43   : > { %735 = vrot.lane.b32.xlu1 %v1185_v27, %s1278_s22  ;;  %745 = vrot.lane.b32.xlu0 %v577_v32, %s1282_s29 }
  0x47   : > { %747 = vrot.lane.b32.xlu1 %v578_v18, %s1282_s29  ;;  %757 = vrot.lane.b32.xlu0 %v630_v12, %s1283_s30 }
  0x4b   : > { %759 = vrot.lane.b32.xlu1 %v631_v13, %s1283_s30  ;;  %769 = vrot.lane.b32.xlu0 %v1554_v20, %s1284_s5 }
  0x4f   : > { %771 = vrot.lane.b32.xlu1 %v635_v3, %s1284_s5  ;;  %781 = vrot.lane.b32.xlu0 %v671_v22, %s1285_s6 }
  0x53   : > { %783 = vrot.lane.b32.xlu1 %v672_v63, %s1285_s6 }
  0x85   : > { %v680_v62 = vpop.permute.xlu0 %679 }
  0x86   : > { %v732_v9 = vpop.permute.xlu1 %731  ;;  %v791_v47 = vsel %vm785_vm0, %v452_v53, %v680_v62 }
  0x89   : > { %v730_v31 = vpop.permute.xlu0 %729 }
  0x8d   : > { %v692_v21 = vpop.permute.xlu1 %691  ;;  %v678_v29 = vpop.permute.xlu0 %677 }
  0x8e   : > { %v788_v20 = vsel %vm785_vm0, %v451_v55, %v678_v29  ;;  %v802_v36 = vsel %vm798_vm1, %v791_v47, %v692_v21 }
  0x91   : > { %v704_v42 = vpop.permute.xlu1 %703  ;;  %v702_v0 = vpop.permute.xlu0 %701 }
  0x92   : > { %v811_v52 = vsel %vm807_vm5, %v802_v36, %v704_v42 }
  0x93   : > { %v820_v50 = vsel %vm816_vm6, %v811_v52, %v732_v9 }
  0x95   : > { %v744_v26 = vpop.permute.xlu1 %743  ;;  %v742_v11 = vpop.permute.xlu0 %741 }
  0x96   : > { %v829_v25 = vsel %vm825_vm7, %v820_v50, %v744_v26 }
  0x99   : > { %v690_v34 = vpop.permute.xlu1 %689  ;;  %v754_v15 = vpop.permute.xlu0 %753 }
  0x9a   : > { %v800_v37 = vsel %vm798_vm1, %v788_v20, %v690_v34 }
  0x9b   : > { %v809_v43 = vsel %vm807_vm5, %v800_v37, %v702_v0 }
  0x9c   : > { %v818_v44 = vsel %vm816_vm6, %v809_v43, %v730_v31 }
  0x9d   : > { %v827_v45 = vsel %vm825_vm7, %v818_v44, %v742_v11  ;;  %v756_v24 = vpop.permute.xlu1 %755  ;;  %v766_v30 = vpop.permute.xlu0 %765 }
  0x9e   : > { %v836_v49 = vsel %vm834_vm8, %v827_v45, %v754_v15  ;;  %v838_v55 = vsel %vm834_vm8, %v829_v25, %v756_v24 }
  0x9f   : > { %v845_v39 = vsel %vm843_vm9, %v836_v49, %v766_v30 }
  0xa1   : > { %v768_v38 = vpop.permute.xlu1 %767  ;;  %v778_v54 = vpop.permute.xlu0 %777 }
  0xa2   : > { %v854_v58 = vsel %vm852_vm10, %v845_v39, %v778_v54  ;;  %v847_v48 = vsel %vm843_vm9, %v838_v55, %v768_v38 }
  0xa3   : > { %1226 = vmatprep.mubr.msk.bf16.mxu0 %vm881_vm11, %v854_v58 }
  0xa5   : > { %v682_v53 = vpop.permute.xlu1 %681  ;;  %v780_v56 = vpop.permute.xlu0 %779 }
  0xa6   : > { %v856_v57 = vsel %vm852_vm10, %v847_v48, %v780_v56  ;;  %v794_v18 = vsel %vm785_vm0, %v453_v40, %v682_v53 }
  0xa7   : > { %1227 = vmatmul.mubr.msk.bf16.vlgmr.msra.gmra.mrb[0].mxu0 %vm881_vm11, %v856_v57 }
  0xa9   : > { %v684_v60 = vpop.permute.xlu1 %683  ;;  %v694_v61 = vpop.permute.xlu0 %693 }
  0xaa   : > { %v804_v33 = vsel %vm798_vm1, %v794_v18, %v694_v61  ;;  %v797_v10 = vsel %vm785_vm0, %v454_v4, %v684_v60 }
  0xad   : > { %v696_v2 = vpop.permute.xlu1 %695  ;;  %v706_v27 = vpop.permute.xlu0 %705 }
  0xae   : > { %v813_v12 = vsel %vm807_vm5, %v804_v33, %v706_v27  ;;  %v806_v51 = vsel %vm798_vm1, %v797_v10, %v696_v2 }
  0xb1   : > { %v708_v6 = vpop.permute.xlu1 %707  ;;  %v734_v19 = vpop.permute.xlu0 %733 }
  0xb2   : > { %v822_v8 = vsel %vm816_vm6, %v813_v12, %v734_v19  ;;  %v815_v1 = vsel %vm807_vm5, %v806_v51, %v708_v6 }
  0xb5   : > { %v736_v28 = vpop.permute.xlu1 %735  ;;  %v746_v32 = vpop.permute.xlu0 %745 }
  0xb6   : > { %v831_v41 = vsel %vm825_vm7, %v822_v8, %v746_v32  ;;  %v824_v14 = vsel %vm816_vm6, %v815_v1, %v736_v28 }
  0xb9   : > { %v748_v59 = vpop.permute.xlu1 %747  ;;  %v758_v7 = vpop.permute.xlu0 %757 }
  0xba   : > { %v840_v16 = vsel %vm834_vm8, %v831_v41, %v758_v7  ;;  %v833_v23 = vsel %vm825_vm7, %v824_v14, %v748_v59 }
  0xbd   : > { %v760_v46 = vpop.permute.xlu1 %759  ;;  %v770_v13 = vpop.permute.xlu0 %769 }
  0xbe   : > { %v849_v5 = vsel %vm843_vm9, %v840_v16, %v770_v13  ;;  %v842_v3 = vsel %vm834_vm8, %v833_v23, %v760_v46 }
  0xc1   : > { %v772_v40 = vpop.permute.xlu1 %771  ;;  %v782_v4 = vpop.permute.xlu0 %781 }
  0xc2   : > { %v858_v17 = vsel %vm852_vm10, %v849_v5, %v782_v4  ;;  %v851_v35 = vsel %vm843_vm9, %v842_v3, %v772_v40 }
  0xc3   : > { %1230 = vmatprep.mubr.msk.bf16.mxu1 %vm881_vm11, %v858_v17 }
  0xc5   : > { %v784_v22 = vpop.permute.xlu1 %783 }
  0xc6   : > { %v860_v63 = vsel %vm852_vm10, %v851_v35, %v784_v22 }
  0xc7   : > { %1231 = vmatmul.mubr.msk.bf16.vlgmr.msra.gmra.mrb[0].mxu1 %vm881_vm11, %v860_v63 }
 0x17a   : > { %v1228_v62 = vpop.f32.mrb[0].mxu0 }
 0x17b   : > { %v1207_v9 = vpack.c.bf16 %v1228_v62, %v1228_v62  ;;  %v928_v31 = vpop.f32.mrb[1].mxu0  ;;  %v962_v37 = vsel %vm798_vm1, %v1228_v62, 0.0 }
 0x17c   : > { %v1205_v21 = vpack.c.bf16 %v928_v31, %v928_v31  ;;  %v1229_v29 = vpop.f32.mrb[2].mxu0  ;;  %v959_v26 = vsel %vm798_vm1, %v928_v31, 0.0 }
 0x17d   : > { %1053 = vst.msk [vmem:[%s1697_s11 + $0x8] sm:$0xf] %vm1050_vm12, %v1207_v9  ;;  %v1208_v42 = vpack.c.bf16 %v1229_v29, %v1229_v29  ;;  %v931_v0 = vpop.f32.mrb[3].mxu0  ;;  %v964_v15 = vsel %vm798_vm1, %v1229_v29, 0.0 }
 0x17e   : > { %1051 = vst.msk [vmem:[%s1697_s11] sm:$0xf] %vm1050_vm12, %v1205_v21  ;;  %v960_v11 = vsel %vm798_vm1, %v931_v0, 0.0  ;;  %v1206_v20 = vpack.c.bf16 %v931_v0, %v931_v0 }
 0x17f   : > { %1054 = vst.msk [vmem:[%s1697_s11 + $0xc] sm:$0xf] %vm1050_vm12, %v1208_v42  ;;  %v961_v34 = vadd.f32 %v960_v11, %v959_v26 }
 0x180   : > { %1052 = vst.msk [vmem:[%s1697_s11 + $0x4] sm:$0xf] %vm1050_vm12, %v1206_v20 }
 0x181   : > { %v963_v43 = vadd.f32 %v962_v37, %v961_v34 }
 0x183   : > { %v965_v44 = vadd.f32 %v964_v15, %v963_v43 }
 0x19a   : > { %v1232_v45 = vpop.f32.mrb[0].mxu1 }
 0x19b   : > { %v1211_v24 = vpack.c.bf16 %v1232_v45, %v1232_v45  ;;  %v944_v47 = vpop.f32.mrb[1].mxu1  ;;  %v970_v25 = vsel %vm798_vm1, %v1232_v45, 0.0 }
 0x19c   : > { %v966_v30 = vsel %vm798_vm1, %v944_v47, 0.0  ;;  %v1209_v36 = vpack.c.bf16 %v944_v47, %v944_v47  ;;  %v1233_v49 = vpop.f32.mrb[2].mxu1 }
 0x19d   : > { %1057 = vst.msk [vmem:[%s1697_s11 + $0x18] sm:$0xf] %vm1050_vm12, %v1211_v24  ;;  %v967_v52 = vadd.f32 %v966_v30, %v965_v44  ;;  %v1212_v38 = vpack.c.bf16 %v1233_v49, %v1233_v49  ;;  %v947_v39 = vpop.f32.mrb[3].mxu1  ;;  %v972_v55 = vsel %vm798_vm1, %v1233_v49, 0.0 }
 0x19e   : > { %1055 = vst.msk [vmem:[%s1697_s11 + $0x10] sm:$0xf] %vm1050_vm12, %v1209_v36  ;;  %v968_v54 = vsel %vm798_vm1, %v947_v39, 0.0  ;;  %v1210_v50 = vpack.c.bf16 %v947_v39, %v947_v39 }
 0x19f   : > { %1058 = vst.msk [vmem:[%s1697_s11 + $0x1c] sm:$0xf] %vm1050_vm12, %v1212_v38  ;;  %v969_v58 = vadd.f32 %v968_v54, %v967_v52 }
 0x1a0   : > { %1056 = vst.msk [vmem:[%s1697_s11 + $0x14] sm:$0xf] %vm1050_vm12, %v1210_v50 }
 0x1a1   : > { %v971_v53 = vadd.f32 %v970_v25, %v969_v58 }
 0x1a3   : > { %v973_v48 = vadd.f32 %v972_v55, %v971_v53 }
 0x1a5   : > { %v974_v56 = vrot.slane %v973_v48, 4 }
 0x1a7   : > { %v975_v57 = vadd.f32 %v974_v56, %v973_v48 }
 0x1a9   : > { %v976_v60 = vrot.slane %v975_v57, 2 }
 0x1ab   : > { %v977_v61 = vadd.f32 %v976_v60, %v975_v57 }
 0x1ad   : > { %v978_v2 = vrot.slane %v977_v61, 1 }
 0x1af   : > { %v979_v27 = vadd.f32 %v978_v2, %v977_v61 }
 0x1b1   : > { %v980_v6 = vmul.f32 0.015625, %v979_v27  ;;  %1060 = vst.msk [vmem:[%s211_s14] sm:$0x1] %vm1059_vm13, %v979_v27 }
 0x1b3   : > { %v981_v19 = vsub.f32 %v928_v31, %v980_v6  ;;  %v982_v28 = vsub.f32 %v931_v0, %v980_v6  ;;  %v983_v32 = vsub.f32 %v1228_v62, %v980_v6  ;;  %v984_v59 = vsub.f32 %v1229_v29, %v980_v6 }
 0x1b4   : > { %v985_v7 = vsub.f32 %v944_v47, %v980_v6  ;;  %v986_v18 = vsub.f32 %v947_v39, %v980_v6  ;;  %v987_v46 = vsub.f32 %v1232_v45, %v980_v6  ;;  %v988_v33 = vsub.f32 %v1233_v49, %v980_v6 }
 0x1b5   : > { %v989_v10 = vmul.f32 %v981_v19, %v981_v19  ;;  %v990_v12 = vmul.f32 %v982_v28, %v982_v28  ;;  %v991_v13 = vmul.f32 %v983_v32, %v983_v32  ;;  %v992_v51 = vmul.f32 %v984_v59, %v984_v59 }
 0x1b6   : > { %v993_v40 = vmul.f32 %v985_v7, %v985_v7  ;;  %v994_v23 = vmul.f32 %v986_v18, %v986_v18  ;;  %v995_v3 = vmul.f32 %v987_v46, %v987_v46  ;;  %v996_v22 = vmul.f32 %v988_v33, %v988_v33 }
 0x1b7   : > { %v997_v8 = vsel %vm798_vm1, %v989_v10, 0.0  ;;  %v998_v1 = vsel %vm798_vm1, %v990_v12, 0.0  ;;  %v1000_v14 = vsel %vm798_vm1, %v991_v13, 0.0  ;;  %v1002_v5 = vsel %vm798_vm1, %v992_v51, 0.0 }
 0x1b8   : > { %v999_v41 = vadd.f32 %v998_v1, %v997_v8  ;;  %v1004_v17 = vsel %vm798_vm1, %v993_v40, 0.0  ;;  %v1006_v63 = vsel %vm798_vm1, %v994_v23, 0.0  ;;  %v1008_v9 = vsel %vm798_vm1, %v995_v3, 0.0 }
 0x1b9   : > { %v1010_v21 = vsel %vm798_vm1, %v996_v22, 0.0 }
 0x1ba   : > { %v1001_v16 = vadd.f32 %v1000_v14, %v999_v41 }
 0x1bc   : > { %v1003_v4 = vadd.f32 %v1002_v5, %v1001_v16 }
 0x1be   : > { %v1005_v35 = vadd.f32 %v1004_v17, %v1003_v4 }
 0x1c0   : > { %v1007_v62 = vadd.f32 %v1006_v63, %v1005_v35 }
 0x1c2   : > { %v1009_v31 = vadd.f32 %v1008_v9, %v1007_v62 }
 0x1c4   : > { %v1011_v29 = vadd.f32 %v1010_v21, %v1009_v31 }
 0x1c6   : > { %v1012_v42 = vrot.slane %v1011_v29, 4 }
 0x1c8   : > { %v1013_v0 = vadd.f32 %v1012_v42, %v1011_v29 }
 0x1ca   : > { %v1014_v26 = vrot.slane %v1013_v0, 2 }
 0x1cc   : > { %v1015_v11 = vadd.f32 %v1014_v26, %v1013_v0 }
 0x1ce   : > { %v1016_v20 = vrot.slane %v1015_v11, 1 }
 0x1d0   : > { %v1017_v34 = vadd.f32 %v1016_v20, %v1015_v11 }
 0x1d2   : > { %1061 = vst.msk [vmem:[%s214_s19] sm:$0x1] %vm1059_vm13, %v1017_v34 }
 0x1d3 PF: > { %s15_s15 = sadd.s32 1, %s1275_s15  }
 0x1d4   : > { %p12_p4 = scmp.ge.s32.totalorder %s15_s15, 4  }
 0x1d6   :  { %14 = sbr.rel (!%p12_p4) target bundleno = 1 (0x1), region = 82 }

// kernel: down_pallas.4
= control target key start
LH: loop header
LB: loop body
LE: loop exit
PB: predicated region body
PF: predicated region fallthrough
CT: control target
= control target key end

     0   :  { %s1435_s21 = smov 0   ;;  %s1918_s0 = inlined_call_operand.vmem [shape: bf16[2,64,8], index: 0, kind: input, shape index: {}]   ;;  %s1919_s1 = inlined_call_operand.vmem [shape: f32[1,8], index: 1, kind: input, shape index: {}]   ;;  %s1920_s2 = inlined_call_operand.vmem [shape: f32[1,8], index: 2, kind: input, shape index: {}]   ;;  %s1921_s3 = inlined_call_operand.vmem [shape: bf16[72,8], index: 3, kind: input, shape index: {}]   ;;  %s1922_s4 = inlined_call_operand.vmem [shape: bf16[2,64,8], index: 4, kind: output, shape index: {0}]   ;;  %s1923_s5 = inlined_call_operand.vmem [shape: f32[2,1,8], index: 5, kind: output, shape index: {1}]   ;;  %s1924_s6 = inlined_call_operand.vmem [shape: f32[2,1,8], index: 6, kind: output, shape index: {2}]  }
   0x1 LB: > { %s1263_s22 = sadd.s32 4294967295, %s1389_s21   ;;  %p1267_p0 = scmp.ge.s32.totalorder %s1389_s21, 1  ;;  %s1389_s21 = sphi %s1435_s21, %s17_s21  }
   0x2   : > { %p217_p1 = scmp.lt.s32.totalorder %s1389_s21, 3 }
   0x4   : > { %p218_p2 = pnand %p1267_p0, %p217_p1 }
   0x5   : > { %p253_p3 = scmp.lt.s32.totalorder (!%p218_p2), %s1263_s22, 1  ;;  %v324_v0 = vlaneseq (!%p218_p2)  ;;  %v1458_v4 = vld [vmem:[%s1919_s1] ss:$0 sm:$0xff] (!%p218_p2)  ;;  %vm551_vm0 = vcmask (!%p218_p2), 1046528   ;;  %vm511_vm1 = vcmask (!%p218_p2), 1040384   ;;  %v1391_v27 = vmov (!%p218_p2), 0.0  }
   0x6   : > { %221 = sbr.rel (%p218_p2) target bundleno = 473 (0x1d9), region = 36  ;;  %v1465_v8 = vld [vmem:[%s1920_s2] ss:$0 sm:$0xff] (!%p218_p2)  ;;  %s1392_s9 = smov (!%p218_p2), 8  }
   0x7   : > { %v1445_v1 = vshrl.u32 (!%p218_p2), %v324_v0, 7  ;;  %v1378_v49 = vld [vmem:[%s1921_s3] sm:$0xff] (!%p218_p2)   ;;  %s1393_s10 = smov (!%p218_p2), 32   ;;  %v1379_v0 = vld [vmem:[%s1921_s3 + $0x8] sm:$0xff] (!%p218_p2)   ;;  %s1394_s13 = smov (!%p218_p2), 16  }
   0x8   : > { %1331 = vmatprep.subr.bf16.mxu0 (!%p218_p2), %v1378_v49  ;;  %1349 = vmatprep.subr.bf16.mxu1 (!%p218_p2), %v1378_v49  ;;  %s1395_s16 = smov (!%p218_p2), 56   ;;  %s1396_s17 = smov (!%p218_p2), 24  }
   0x9   : > { %v327_v2 = vadd.s32 (!%p218_p2), 16, %v1445_v1  ;;  %v328_v3 = vadd.s32 (!%p218_p2), 24, %v1445_v1  ;;  %v1468_v11 = vadd.s32 (!%p218_p2), 8, %v1445_v1  ;;  %v337_v15 = vand.u32 (!%p218_p2), 7, %v1445_v1  ;;  %1332 = vmatpush3.bf16.msra.mxu0 (!%p218_p2), %v1378_v49  ;;  %1354 = vmatpush3.bf16.msra.mxu1 (!%p218_p2), %v1378_v49  ;;  %s1397_s20 = smov (!%p218_p2), 40   ;;  %s1398_s24 = smov (!%p218_p2), 48  }
   0xa   : > { %1333 = vmatprep.subr.bf16.mxu0 (!%p218_p2), %v1379_v0  ;;  %1350 = vmatprep.subr.bf16.mxu1 (!%p218_p2), %v1379_v0  ;;  %v329_v49 = vadd.s32 (!%p218_p2), 32, %v1445_v1  ;;  %s1399_s25 = smov (!%p218_p2), 64  }
   0xb   : > { %v351_v9 = vand.u32 (!%p218_p2), 7, %v327_v2  ;;  %v358_v10 = vand.u32 (!%p218_p2), 7, %v328_v3  ;;  %v344_v24 = vand.u32 (!%p218_p2), 7, %v1468_v11  ;;  %vm1534_vm6 = vcmp.ne.s32.totalorder (!%p218_p2), %v337_v15, 0  ;;  %v1380_v11 = vld [vmem:[%s1921_s3 + $0x10] sm:$0xff] (!%p218_p2)  }
   0xc   : > { %vm1582_vm8 = vcmp.ne.s32.totalorder (!%p218_p2), %v337_v15, 7 }
   0xd   : > { %s1932_s22 = smov (!%p253_p3, %s1263_s22), 1  ;;  %vm447_vm2 = vcmp.ne.s32.totalorder %v351_v9, 7  ;;  %vm448_vm3 = vcmp.ne.s32.totalorder %v358_v10, 7  ;;  %vm431_vm4 = vcmp.ne.s32.totalorder %v351_v9, 0  ;;  %vm432_vm5 = vcmp.ne.s32.totalorder %v358_v10, 0  ;;  %1334 = vmatpush3.bf16.msra.mxu0 %v1379_v0  ;;  %1355 = vmatpush3.bf16.msra.mxu1 %v1379_v0 }
   0xe   : > { %s1293_s23 = sshll.u32 %s1932_s22, 5  ;;  %v1483_v28 = vsel %vm447_vm2, 1.0, %v1391_v27  ;;  %v1488_v31 = vsel %vm448_vm3, 1.0, %v1391_v27  ;;  %v1492_v35 = vsel %vm431_vm4, 1.0, %v1391_v27  ;;  %v1500_v39 = vsel %vm432_vm5, 1.0, %v1391_v27  ;;  %1335 = vmatprep.subr.bf16.mxu0 %v1380_v11  ;;  %1351 = vmatprep.subr.bf16.mxu1 %v1380_v11  ;;  %s265_s8 = scalar_lea.vmem %s1923_s5, %s1932_s22 }
   0xf   : > { %s257_s26 = scalar_lea.vmem %s1918_s0, %s1293_s23  ;;  %vm430_vm7 = vcmp.ne.s32.totalorder %v344_v24, 0  ;;  %vm1588_vm9 = vcmp.ne.s32.totalorder %v344_v24, 7  ;;  %vm986_vm4 = vcmask 1043456   ;;  %vm887_vm5 = vcmask 195584   ;;  %s1871_s30 = scalar_lea.vmem %s1922_s4, %s1293_s23 }
  0x10   : > { %v1304_v5 = vld [vmem:[%s257_s26] sm:$0xff]   ;;  %v1319_v6 = vld [vmem:[%s257_s26 + $0x8] sm:$0xff]   ;;  %v1460_v7 = vld [vmem:[%s257_s26 + $0x10] sm:$0xff]   ;;  %v1570_v10 = vsel %vm430_vm7, 1.0, %v1391_v27  ;;  %vm905_vm7 = vcmask 326656   ;;  %s268_s11 = scalar_lea.vmem %s1924_s6, %s1932_s22 }
  0x11   : > { %v1306_v12 = vunpack.c.h.bf16 %v1304_v5  ;;  %v1309_v13 = vunpack.c.l.bf16 %v1319_v6  ;;  %v1470_v14 = vld [vmem:[%s257_s26 + $0x18] sm:$0xff]   ;;  %v1305_v17 = vunpack.c.l.bf16 %v1304_v5  ;;  %v1310_v18 = vunpack.c.h.bf16 %v1319_v6  ;;  %1336 = vmatpush3.bf16.msra.mxu0 %v1380_v11  ;;  %1356 = vmatpush3.bf16.msra.mxu1 %v1380_v11 }
  0x12   : > { %v1318_v16 = vunpack.c.h.bf16 %v1470_v14  ;;  %v1313_v19 = vunpack.c.l.bf16 %v1460_v7  ;;  %v1563_v5 = vsel %vm1534_vm6, 1.0, %v1391_v27  ;;  %v1317_v57 = vunpack.c.l.bf16 %v1470_v14 }
  0x13   : > { %v294_v20 = vmul.f32 %v1306_v12, %v1458_v4  ;;  %v295_v21 = vmul.f32 %v1309_v13, %v1458_v4  ;;  %v293_v22 = vmul.f32 %v1305_v17, %v1458_v4  ;;  %v296_v23 = vmul.f32 %v1310_v18, %v1458_v4 }
  0x14   : > { %v300_v32 = vmul.f32 %v1318_v16, %v1458_v4  ;;  %v297_v36 = vmul.f32 %v1313_v19, %v1458_v4  ;;  %v365_v19 = vand.u32 7, %v329_v49  ;;  %vm896_vm6 = vcmask 261120  }
  0x15   : > { %v309_v25 = vadd.f32 %v1465_v8, %v294_v20  ;;  %v310_v26 = vadd.f32 %v1465_v8, %v295_v21  ;;  %v311_v29 = vadd.f32 %v1465_v8, %v296_v23  ;;  %v308_v30 = vadd.f32 %v1465_v8, %v293_v22 }
  0x16   : > { %v315_v40 = vadd.f32 %v1465_v8, %v300_v32  ;;  %v312_v53 = vadd.f32 %v1465_v8, %v297_v36  ;;  %v454_v32 = vsel %vm1588_vm9, 1.0, %v1391_v27  ;;  %vm449_vm10 = vcmp.ne.s32.totalorder %v365_v19, 7 }
  0x17   : > { %v317_v33 = vmax.f32 %v309_v25, 0.0  ;;  %v318_v34 = vmax.f32 %v310_v26, 0.0  ;;  %v1495_v37 = vmax.f32 %v311_v29, 0.0  ;;  %v1497_v38 = vmax.f32 %v308_v30, 0.0 }
  0x18   : > { %v1519_v52 = vmax.f32 %v315_v40, 0.0  ;;  %v1552_v63 = vmax.f32 %v312_v53, 0.0  ;;  %v1314_v29 = vunpack.c.h.bf16 %v1460_v7  ;;  %v453_v30 = vsel %vm1582_vm8, 1.0, %v1391_v27 }
  0x19   : > { %v548_v41 = vpack.c.bf16 %v318_v34, %v317_v33  ;;  %v1503_v42 = vrot.slane %v317_v33, 1  ;;  %v557_v43 = vrot.slane %v318_v34, 1  ;;  %v1505_v44 = vrot.slane %v317_v33, 7 }
  0x1a   : > { %v635_v45 = vpack.c.bf16 %v1495_v37, %v318_v34  ;;  %v634_v46 = vpack.c.bf16 %v317_v33, %v1497_v38  ;;  %v559_v47 = vrot.slane %v1495_v37, 1  ;;  %v517_v48 = vrot.slane %v318_v34, 7 }
  0x1b   : > { %775 = vrot.lane.b32.xlu0 %v548_v41, %s1392_s9  ;;  %v1516_v50 = vsel %vm551_vm0, %v1503_v42, %v557_v43  ;;  %v519_v51 = vrot.slane %v1495_v37, 7  ;;  %v1550_v62 = vmul.f32 0.0, %v1519_v52  ;;  %v1566_v6 = vrot.slane %v1497_v38, 7 }
  0x1c   : > { %811 = vrot.lane.b32.xlu1 %v635_v45, %s1393_s10  ;;  %v1524_v54 = vsel %vm551_vm0, %v557_v43, %v559_v47  ;;  %v579_v55 = vmul.f32 %v1516_v50, %v1483_v28  ;;  %v1530_v56 = vsel %vm511_vm1, %v1505_v44, %v517_v48  ;;  %v561_v9 = vrot.slane %v1552_v63, 1  ;;  %v1381_v45 = vld [vmem:[%s1921_s3 + $0x18] sm:$0xff]  }
  0x1d   : > { %v580_v58 = vmul.f32 %v1524_v54, %v1488_v31  ;;  %v1541_v59 = vsel %vm511_vm1, %v517_v48, %v519_v51  ;;  %v624_v60 = vmul.f32 %v1530_v56, %v1492_v35  ;;  %v665_v3 = vmul.f32 %v1524_v54, %v1483_v28  ;;  %1337 = vmatprep.subr.bf16.mxu0 %v1381_v45 }
  0x1e   : > { %v625_v61 = vmul.f32 %v1541_v59, %v1500_v39  ;;  %v1573_v12 = vrot.slane %v1519_v52, 7  ;;  %v521_v13 = vrot.slane %v1552_v63, 7  ;;  %v516_v17 = vsel %vm511_vm1, %v1566_v6, %v1505_v44  ;;  %1338 = vmatpush3.bf16.msra.mxu0 %v1381_v45  ;;  %1352 = vmatprep.subr.bf16.mxu1 %v1381_v45 }
  0x1f   : > { %809 = vrot.lane.b32.xlu0 %v634_v46, %s1393_s10  ;;  %v586_v2 = vpack.c.bf16 %v580_v58, %v579_v55  ;;  %v547_v20 = vpack.c.bf16 %v1497_v38, %v1550_v62  ;;  %v1597_v21 = vsel %vm551_vm0, %v559_v47, %v561_v9  ;;  %v1603_v22 = vmul.f32 %v516_v17, %v1492_v35 }
  0x20   : > { %v631_v16 = vpack.c.bf16 %v625_v61, %v624_v60  ;;  %v621_v15 = vsel %vm511_vm1, %v1573_v12, %v1566_v6  ;;  %v666_v23 = vmul.f32 %v1597_v21, %v1488_v31  ;;  %v623_v25 = vmul.f32 %v516_v17, %v1570_v10  ;;  %1357 = vmatpush3.bf16.msra.mxu1 %v1381_v45 }
  0x21   : > { %787 = vrot.lane.b32.xlu1 %v586_v2, %s1394_s13  ;;  %v622_v24 = vmul.f32 %v621_v15, %v1563_v5  ;;  %v1616_v26 = vsel %vm511_vm1, %v519_v51, %v521_v13  ;;  %v1626_v33 = vrot.slane %v1497_v38, 1  ;;  %v718_v7 = vmul.f32 %v1541_v59, %v1492_v35 }
  0x22   : > { %v672_v34 = vpack.c.bf16 %v666_v23, %v665_v3  ;;  %v719_v36 = vmul.f32 %v1616_v26, %v1500_v39  ;;  %v1634_v40 = vmul.f32 0.0, %v1497_v38  ;;  %v552_v43 = vrot.slane %v1550_v62, 1 }
  0x23   : > { %845 = vrot.lane.b32.xlu0 %v548_v41, %s1395_s16  ;;  %v556_v41 = vsel %vm551_vm0, %v1626_v33, %v1503_v42  ;;  %v630_v35 = vpack.c.bf16 %v623_v25, %v622_v24  ;;  %v664_v47 = vmul.f32 %v1516_v50, %v454_v32  ;;  %v298_v48 = vmul.f32 %v1314_v29, %v1458_v4 }
  0x24   : > { %v663_v46 = vmul.f32 %v556_v41, %v453_v30  ;;  %v684_v38 = vrot.slane %v1634_v40, 7  ;;  %v330_v51 = vadd.s32 40, %v1445_v1  ;;  %v725_v53 = vpack.c.bf16 %v719_v36, %v718_v7 }
  0x25   : > { %799 = vrot.lane.b32.xlu1 %v631_v16, %s1396_s17  ;;  %v331_v58 = vadd.s32 48, %v1445_v1  ;;  %v717_v60 = vmul.f32 %v1530_v56, %v1570_v10  ;;  %v554_v61 = vsel %vm551_vm0, %v552_v43, %v1626_v33  ;;  %v313_v0 = vadd.f32 %v1465_v8, %v298_v48 }
  0x26   : > { %v715_v55 = vsel %vm511_vm1, %v684_v38, %v1505_v44  ;;  %v332_v2 = vadd.s32 56, %v1445_v1  ;;  %v671_v44 = vpack.c.bf16 %v664_v47, %v663_v46  ;;  %v299_v3 = vmul.f32 %v1317_v57, %v1458_v4 }
  0x27   : > { %773 = vrot.lane.b32.xlu0 %v547_v20, %s1392_s9  ;;  %v716_v14 = vmul.f32 %v715_v55, %v1563_v5  ;;  %v549_v16 = vpack.c.bf16 %v1552_v63, %v1495_v37  ;;  %v578_v17 = vmul.f32 %v556_v41, %v454_v32  ;;  %v1669_v18 = vmax.f32 %v313_v0, 0.0 }
  0x28   : > { %v577_v1 = vmul.f32 %v554_v61, %v453_v30  ;;  %v314_v20 = vadd.f32 %v1465_v8, %v299_v3  ;;  %v372_v15 = vand.u32 7, %v330_v51  ;;  %v379_v11 = vand.u32 7, %v331_v58 }
  0x29   : > { %823 = vrot.lane.b32.xlu1 %v672_v34, %s1397_s20  ;;  %v563_v23 = vrot.slane %v1669_v18, 1  ;;  %v386_v24 = vand.u32 7, %v332_v2  ;;  %v724_v4 = vpack.c.bf16 %v717_v60, %v716_v14  ;;  %v757_v37 = vmul.f32 %v1516_v50, %v453_v30 }
  0x2a   : > { %v758_v25 = vmul.f32 %v1524_v54, %v454_v32  ;;  %v1677_v29 = vmax.f32 %v314_v20, 0.0  ;;  %v585_v8 = vpack.c.bf16 %v578_v17, %v577_v1  ;;  %vm450_vm11 = vcmp.ne.s32.totalorder %v372_v15, 7 }
  0x2b   : > { %797 = vrot.lane.b32.xlu0 %v630_v35, %s1396_s17  ;;  %v564_v34 = vsel %vm551_vm0, %v561_v9, %v563_v23  ;;  %vm451_vm12 = vcmp.ne.s32.totalorder %v379_v11, 7  ;;  %v759_v36 = vmul.f32 %v1597_v21, %v1483_v28  ;;  %vm452_vm13 = vcmp.ne.s32.totalorder %v386_v24, 7 }
  0x2c   : > { %v565_v7 = vrot.slane %v1677_v29, 1  ;;  %v765_v50 = vpack.c.bf16 %v758_v25, %v757_v37  ;;  %v760_v54 = vmul.f32 %v564_v34, %v1488_v31  ;;  %v1689_v30 = vsel %vm449_vm10, 1.0, %v1391_v27 }
  0x2d   : > { %835 = vrot.lane.b32.xlu1 %v725_v53, %s1398_s24  ;;  %vm433_vm14 = vcmp.ne.s32.totalorder %v365_v19, 0  ;;  %v1692_v9 = vsel %vm450_vm11, 1.0, %v1391_v27  ;;  %v1695_v32 = vsel %vm451_vm12, 1.0, %v1391_v27  ;;  %v523_v41 = vrot.slane %v1669_v18, 7 }
  0x2e   : > { %v1700_v28 = vsel %vm452_vm13, 1.0, %v1391_v27  ;;  %v1703_v45 = vsel %vm551_vm0, %v563_v23, %v565_v7  ;;  %v576_v31 = vsel %vm551_vm0, %v565_v7, %v552_v43  ;;  %vm434_vm15 = vcmp.ne.s32.totalorder %v372_v15, 0 }
  0x2f   : > { %821 = vrot.lane.b32.xlu0 %v671_v44, %s1397_s20  ;;  %v581_v35 = vmul.f32 %v1597_v21, %v1689_v30  ;;  %v1711_v46 = vsel %vm433_vm14, 1.0, %v1391_v27  ;;  %v502_v47 = vrot.slane %v1677_v29, 7  ;;  %v766_v48 = vpack.c.bf16 %v760_v54, %v759_v36 }
  0x30   : > { %v582_v49 = vmul.f32 %v564_v34, %v1692_v9  ;;  %vm435_vm2 = vcmp.ne.s32.totalorder %v379_v11, 0  ;;  %vm436_vm3 = vcmp.ne.s32.totalorder %v386_v24, 0  ;;  %v583_v43 = vmul.f32 %v1703_v45, %v1695_v32 }
  0x31   : > { %847 = vrot.lane.b32.xlu1 %v549_v16, %s1395_s16  ;;  %v584_v51 = vmul.f32 %v576_v31, %v1700_v28  ;;  %v442_v21 = vsel %vm434_vm15, 1.0, %v1391_v27  ;;  %v524_v53 = vsel %vm511_vm1, %v521_v13, %v523_v41  ;;  %v512_v55 = vrot.slane %v1550_v62, 7 }
  0x32   : > { %v1727_v57 = vpack.c.bf16 %v1677_v29, %v1669_v18  ;;  %v443_v58 = vsel %vm435_vm2, 1.0, %v1391_v27  ;;  %v444_v60 = vsel %vm436_vm3, 1.0, %v1391_v27  ;;  %v525_v61 = vsel %vm511_vm1, %v523_v41, %v502_v47 }
  0x33   : > { %833 = vrot.lane.b32.xlu0 %v724_v4, %s1398_s24  ;;  %v612_v0 = vsel %vm511_vm1, %v502_v47, %v1573_v12  ;;  %v587_v13 = vpack.c.bf16 %v582_v49, %v581_v35  ;;  %v626_v62 = vmul.f32 %v1616_v26, %v1711_v46  ;;  %v627_v2 = vmul.f32 %v524_v53, %v442_v21 }
  0x34   : > { %v588_v44 = vpack.c.bf16 %v584_v51, %v583_v43  ;;  %v1739_v14 = vmul.f32 %v1530_v56, %v1500_v39  ;;  %v628_v27 = vmul.f32 %v525_v61, %v443_v58  ;;  %v629_v3 = vmul.f32 %v612_v0, %v444_v60  ;;  %v1382_v56 = vld [vmem:[%s1921_s3 + $0x20] ss:$0 sps:$4 sm:$0xff]  }
  0x35   : > { %785 = vrot.lane.b32.xlu1 %v585_v8, %s1394_s13  ;;  %v534_v17 = vsel %vm511_vm1, %v502_v47, %v512_v55  ;;  %v632_v1 = vpack.c.bf16 %v627_v2, %v626_v62  ;;  %v514_v39 = vsel %vm511_vm1, %v512_v55, %v1566_v6  ;;  %v636_v15 = vpack.c.bf16 %v1669_v18, %v1552_v63 }
  0x36   : > { %v544_v19 = vpack.c.bf16 %v1739_v14, %v1603_v22  ;;  %v1749_v20 = vmul.f32 %v534_v17, %v1563_v5  ;;  %v667_v11 = vmul.f32 %v564_v34, %v1689_v30  ;;  %v1760_v23 = vmul.f32 %v514_v39, %v1570_v10  ;;  %1359 = vmatprep.subr.msk.bf16.mxu0 %vm986_vm4, %v1382_v56 }
  0x37   : > { %857 = vrot.lane.b32.xlu0 %v765_v50, %s1399_s25  ;;  %v633_v24 = vpack.c.bf16 %v629_v3, %v628_v27  ;;  %v1766_v6 = vmul.f32 %v1541_v59, %v1711_v46  ;;  %v1769_v4 = vmul.f32 %v1616_v26, %v442_v21  ;;  %v1775_v10 = vmul.f32 %v524_v53, %v443_v58 }
  0x38   : > { %v543_v18 = vpack.c.bf16 %v1760_v23, %v1749_v20  ;;  %v668_v37 = vmul.f32 %v1703_v45, %v1692_v9  ;;  %v988_v26 = vsel %vm986_vm4, %v1382_v56, 0  ;;  %v1782_v25 = vmul.f32 %v525_v61, %v444_v60  ;;  %1360 = vmatprep.subr.msk.bf16.mxu1 %vm986_vm4, %v1382_v56 }
  0x39   : > { %777 = vrot.lane.b32.xlu1 %v549_v16, %s1392_s9  ;;  %v651_v16 = vrot.slane %v1519_v52, 1  ;;  %v545_v59 = vpack.c.bf16 %v1769_v4, %v1766_v6  ;;  %1340 = vmatpush3.bf16.msra.mxu0 %v988_v26  ;;  %v706_v36 = vsel %vm511_vm1, %v1573_v12, %v684_v38  ;;  %v720_v50 = vmul.f32 %v524_v53, %v1711_v46 }
  0x3a   : > { %1358 = vmatpush3.bf16.msra.mxu1 %v988_v26  ;;  %v721_v54 = vmul.f32 %v525_v61, %v442_v21  ;;  %v722_v31 = vmul.f32 %v612_v0, %v443_v58  ;;  %v723_v35 = vmul.f32 %v706_v36, %v444_v60  ;;  %v745_v47 = vrot.slane %v1634_v40, 1 }
  0x3b   : > { %859 = vrot.lane.b32.xlu0 %v766_v48, %s1399_s25  ;;  %v652_v5 = vsel %vm551_vm0, %v565_v7, %v651_v16  ;;  %v662_v63 = vsel %vm551_vm0, %v651_v16, %v1626_v33  ;;  %v637_v33 = vpack.c.bf16 %v1519_v52, %v1677_v29  ;;  %v546_v7 = vpack.c.bf16 %v1782_v25, %v1775_v10 }
  0x3c   : > { %v669_v34 = vmul.f32 %v652_v5, %v1695_v32  ;;  %v670_v8 = vmul.f32 %v662_v63, %v1700_v28  ;;  %v673_v29 = vpack.c.bf16 %v668_v37, %v667_v11  ;;  %v726_v48 = vpack.c.bf16 %v721_v54, %v720_v50 }
  0x3d   : > { %779 = vrot.lane.b32.xlu1 %v1727_v57, %s1392_s9  ;;  %v727_v49 = vpack.c.bf16 %v723_v35, %v722_v31  ;;  %v746_v12 = vsel %vm551_vm0, %v651_v16, %v745_v47  ;;  %v756_v38 = vsel %vm551_vm0, %v745_v47, %v1503_v42  ;;  %v761_v46 = vmul.f32 %v1703_v45, %v1689_v30 }
  0x3e   : > { %v674_v41 = vpack.c.bf16 %v670_v8, %v669_v34  ;;  %v762_v43 = vmul.f32 %v652_v5, %v1692_v9  ;;  %v731_v51 = vpack.c.bf16 %v1634_v40, %v1519_v52  ;;  %v763_v21 = vmul.f32 %v746_v12, %v1695_v32 }
  0x3f   : > { %789 = vrot.lane.b32.xlu0 %v587_v13, %s1394_s13  ;;  %v764_v53 = vmul.f32 %v756_v38, %v1700_v28  ;;  %vm865_vm0 = vcmask 64512   ;;  %vm878_vm1 = vcmask 130048   ;;  %vm914_vm8 = vcmask 392192  }
  0x40   : > { %v767_v42 = vpack.c.bf16 %v762_v43, %v761_v46  ;;  %vm923_vm9 = vcmask 457728   ;;  %vm932_vm10 = vcmask 523264   ;;  %vm977_vm11 = vcmask 588800  }
  0x41   : > { %791 = vrot.lane.b32.xlu1 %v588_v44, %s1394_s13  ;;  %v768_v55 = vpack.c.bf16 %v764_v53, %v763_v21  ;;  %vm1146_vm12 = vcmask 60416   ;;  %vm1155_vm13 = vcmask 57344  }
  0x43   : > { %801 = vrot.lane.b32.xlu0 %v632_v1, %s1396_s17 }
  0x45   : > { %803 = vrot.lane.b32.xlu1 %v633_v24, %s1396_s17 }
  0x47   : > { %813 = vrot.lane.b32.xlu0 %v636_v15, %s1393_s10 }
  0x49   : > { %815 = vrot.lane.b32.xlu1 %v637_v33, %s1393_s10 }
  0x4b   : > { %825 = vrot.lane.b32.xlu0 %v673_v29, %s1397_s20 }
  0x4d   : > { %827 = vrot.lane.b32.xlu1 %v674_v41, %s1397_s20 }
  0x4f   : > { %837 = vrot.lane.b32.xlu0 %v726_v48, %s1398_s24 }
  0x51   : > { %839 = vrot.lane.b32.xlu1 %v727_v49, %s1398_s24 }
  0x53   : > { %849 = vrot.lane.b32.xlu0 %v1727_v57, %s1395_s16 }
  0x55   : > { %851 = vrot.lane.b32.xlu1 %v731_v51, %s1395_s16 }
  0x57   : > { %861 = vrot.lane.b32.xlu0 %v767_v42, %s1399_s25 }
  0x59   : > { %863 = vrot.lane.b32.xlu1 %v768_v55, %s1399_s25 }
  0x8d   : > { %v776_v30 = vpop.permute.xlu0 %775 }
  0x8e   : > { %v812_v9 = vpop.permute.xlu1 %811  ;;  %v871_v13 = vsel %vm865_vm0, %v544_v19, %v776_v30 }
  0x91   : > { %v810_v45 = vpop.permute.xlu0 %809 }
  0x93   : > { %v788_v58 = vpop.permute.xlu1 %787 }
  0x94   : > { %v882_v2 = vsel %vm878_vm1, %v871_v13, %v788_v58 }
  0x95   : > { %v846_v52 = vpop.permute.xlu0 %845 }
  0x97   : > { %v800_v40 = vpop.permute.xlu1 %799 }
  0x98   : > { %v891_v44 = vsel %vm887_vm5, %v882_v2, %v800_v40 }
  0x99   : > { %v774_v32 = vpop.permute.xlu0 %773  ;;  %v900_v17 = vsel %vm896_vm6, %v891_v44, %v812_v9 }
  0x9a   : > { %v868_v27 = vsel %vm865_vm0, %v543_v18, %v774_v32 }
  0x9b   : > { %v824_v60 = vpop.permute.xlu1 %823 }
  0x9c   : > { %v909_v1 = vsel %vm905_vm7, %v900_v17, %v824_v60 }
  0x9d   : > { %v798_v28 = vpop.permute.xlu0 %797 }
  0x9f   : > { %v836_v61 = vpop.permute.xlu1 %835 }
  0xa0   : > { %v918_v56 = vsel %vm914_vm8, %v909_v1, %v836_v61 }
  0xa1   : > { %v822_v0 = vpop.permute.xlu0 %821 }
  0xa3   : > { %v848_v57 = vpop.permute.xlu1 %847 }
  0xa4   : > { %v927_v11 = vsel %vm923_vm9, %v918_v56, %v848_v57 }
  0xa5   : > { %v834_v62 = vpop.permute.xlu0 %833 }
  0xa7   : > { %v786_v3 = vpop.permute.xlu1 %785 }
  0xa8   : > { %v880_v16 = vsel %vm878_vm1, %v868_v27, %v786_v3 }
  0xa9   : > { %v889_v22 = vsel %vm887_vm5, %v880_v16, %v798_v28  ;;  %v858_v14 = vpop.permute.xlu0 %857 }
  0xaa   : > { %v898_v19 = vsel %vm896_vm6, %v889_v22, %v810_v45 }
  0xab   : > { %v778_v39 = vpop.permute.xlu1 %777  ;;  %v907_v20 = vsel %vm905_vm7, %v898_v19, %v822_v0 }
  0xac   : > { %v916_v15 = vsel %vm914_vm8, %v907_v20, %v834_v62  ;;  %v874_v41 = vsel %vm865_vm0, %v545_v59, %v778_v39 }
  0xad   : > { %v860_v23 = vpop.permute.xlu0 %859  ;;  %v925_v24 = vsel %vm923_vm9, %v916_v15, %v846_v52 }
  0xae   : > { %v936_v5 = vsel %vm932_vm10, %v927_v11, %v860_v23  ;;  %v934_v63 = vsel %vm932_vm10, %v925_v24, %v858_v14 }
  0xaf   : > { %v780_v18 = vpop.permute.xlu1 %779  ;;  %1341 = vmatprep.mubr.msk.bf16.mxu0 %vm977_vm11, %v934_v63 }
  0xb0   : > { %1342 = vmatmul.mubr.msk.bf16.vlgmr.msra.gmra.mrb[0].mxu0 %vm977_vm11, %v936_v5  ;;  %v877_v47 = vsel %vm865_vm0, %v546_v7, %v780_v18 }
  0xb1   : > { %v790_v37 = vpop.permute.xlu0 %789 }
  0xb2   : > { %v884_v35 = vsel %vm878_vm1, %v874_v41, %v790_v37 }
  0xb3   : > { %v792_v26 = vpop.permute.xlu1 %791 }
  0xb4   : > { %v886_v12 = vsel %vm878_vm1, %v877_v47, %v792_v26 }
  0xb5   : > { %v802_v33 = vpop.permute.xlu0 %801 }
  0xb6   : > { %v893_v48 = vsel %vm887_vm5, %v884_v35, %v802_v33 }
  0xb7   : > { %v804_v34 = vpop.permute.xlu1 %803 }
  0xb8   : > { %v895_v6 = vsel %vm887_vm5, %v886_v12, %v804_v34 }
  0xb9   : > { %v814_v8 = vpop.permute.xlu0 %813 }
  0xba   : > { %v902_v38 = vsel %vm896_vm6, %v893_v48, %v814_v8 }
  0xbb   : > { %v816_v36 = vpop.permute.xlu1 %815 }
  0xbc   : > { %v904_v46 = vsel %vm896_vm6, %v895_v6, %v816_v36 }
  0xbd   : > { %v826_v29 = vpop.permute.xlu0 %825 }
  0xbe   : > { %v911_v4 = vsel %vm905_vm7, %v902_v38, %v826_v29 }
  0xbf   : > { %v828_v50 = vpop.permute.xlu1 %827 }
  0xc0   : > { %v913_v10 = vsel %vm905_vm7, %v904_v46, %v828_v50 }
  0xc1   : > { %v838_v54 = vpop.permute.xlu0 %837 }
  0xc2   : > { %v920_v43 = vsel %vm914_vm8, %v911_v4, %v838_v54 }
  0xc3   : > { %v840_v31 = vpop.permute.xlu1 %839 }
  0xc4   : > { %v922_v51 = vsel %vm914_vm8, %v913_v10, %v840_v31 }
  0xc5   : > { %v850_v49 = vpop.permute.xlu0 %849 }
  0xc6   : > { %v929_v25 = vsel %vm923_vm9, %v920_v43, %v850_v49 }
  0xc7   : > { %v852_v59 = vpop.permute.xlu1 %851 }
  0xc8   : > { %v931_v53 = vsel %vm923_vm9, %v922_v51, %v852_v59 }
  0xc9   : > { %v862_v7 = vpop.permute.xlu0 %861 }
  0xca   : > { %v938_v21 = vsel %vm932_vm10, %v929_v25, %v862_v7 }
  0xcb   : > { %v864_v42 = vpop.permute.xlu1 %863  ;;  %1345 = vmatprep.mubr.msk.bf16.mxu1 %vm977_vm11, %v938_v21 }
  0xcc   : > { %v940_v55 = vsel %vm932_vm10, %v931_v53, %v864_v42 }
  0xcd   : > { %1346 = vmatmul.mubr.msk.bf16.vlgmr.msra.gmra.mrb[0].mxu1 %vm977_vm11, %v940_v55 }
 0x183   : > { %v1343_v30 = vpop.f32.mrb[0].mxu0 }
 0x184   : > { %v1297_v9 = vpack.c.bf16 %v1343_v30, %v1343_v30  ;;  %v1024_v45 = vpop.f32.mrb[1].mxu0  ;;  %v1058_v57 = vsel %vm865_vm0, %v1343_v30, 0.0 }
 0x185   : > { %v1295_v58 = vpack.c.bf16 %v1024_v45, %v1024_v45  ;;  %v1344_v52 = vpop.f32.mrb[2].mxu0  ;;  %v1055_v60 = vsel %vm865_vm0, %v1024_v45, 0.0 }
 0x186   : > { %1149 = vst.msk [vmem:[%s1871_s30 + $0x8] sm:$0xf] %vm1146_vm12, %v1297_v9  ;;  %v1298_v40 = vpack.c.bf16 %v1344_v52, %v1344_v52  ;;  %v1027_v32 = vpop.f32.mrb[3].mxu0  ;;  %v1060_v62 = vsel %vm865_vm0, %v1344_v52, 0.0 }
 0x187   : > { %1147 = vst.msk [vmem:[%s1871_s30] sm:$0xf] %vm1146_vm12, %v1295_v58  ;;  %v1056_v28 = vsel %vm865_vm0, %v1027_v32, 0.0  ;;  %v1296_v61 = vpack.c.bf16 %v1027_v32, %v1027_v32 }
 0x188   : > { %1150 = vst.msk [vmem:[%s1871_s30 + $0xc] sm:$0xf] %vm1146_vm12, %v1298_v40  ;;  %v1057_v0 = vadd.f32 %v1056_v28, %v1055_v60 }
 0x189   : > { %1148 = vst.msk [vmem:[%s1871_s30 + $0x4] sm:$0xf] %vm1146_vm12, %v1296_v61 }
 0x18a   : > { %v1059_v13 = vadd.f32 %v1058_v57, %v1057_v0 }
 0x18c   : > { %v1061_v2 = vadd.f32 %v1060_v62, %v1059_v13 }
 0x1a0   : > { %v1347_v44 = vpop.f32.mrb[0].mxu1 }
 0x1a1   : > { %v1301_v27 = vpack.c.bf16 %v1347_v44, %v1347_v44  ;;  %v1040_v3 = vpop.f32.mrb[1].mxu1  ;;  %v1066_v15 = vsel %vm865_vm0, %v1347_v44, 0.0 }
 0x1a2   : > { %v1062_v16 = vsel %vm865_vm0, %v1040_v3, 0.0  ;;  %v1299_v22 = vpack.c.bf16 %v1040_v3, %v1040_v3  ;;  %v1348_v14 = vpop.f32.mrb[2].mxu1 }
 0x1a3   : > { %1153 = vst.msk [vmem:[%s1871_s30 + $0x18] sm:$0xf] %vm1146_vm12, %v1301_v27  ;;  %v1063_v17 = vadd.f32 %v1062_v16, %v1061_v2  ;;  %v1302_v19 = vpack.c.bf16 %v1348_v14, %v1348_v14  ;;  %v1043_v1 = vpop.f32.mrb[3].mxu1  ;;  %v1068_v23 = vsel %vm865_vm0, %v1348_v14, 0.0 }
 0x1a4   : > { %1151 = vst.msk [vmem:[%s1871_s30 + $0x10] sm:$0xf] %vm1146_vm12, %v1299_v22  ;;  %v1064_v39 = vsel %vm865_vm0, %v1043_v1, 0.0  ;;  %v1300_v20 = vpack.c.bf16 %v1043_v1, %v1043_v1 }
 0x1a5   : > { %1154 = vst.msk [vmem:[%s1871_s30 + $0x1c] sm:$0xf] %vm1146_vm12, %v1302_v19  ;;  %v1065_v56 = vadd.f32 %v1064_v39, %v1063_v17 }
 0x1a6   : > { %1152 = vst.msk [vmem:[%s1871_s30 + $0x14] sm:$0xf] %vm1146_vm12, %v1300_v20 }
 0x1a7   : > { %v1067_v11 = vadd.f32 %v1066_v15, %v1065_v56 }
 0x1a9   : > { %v1069_v24 = vadd.f32 %v1068_v23, %v1067_v11 }
 0x1ab   : > { %v1070_v5 = vrot.slane %v1069_v24, 4 }
 0x1ad   : > { %v1071_v63 = vadd.f32 %v1070_v5, %v1069_v24 }
 0x1af   : > { %v1072_v18 = vrot.slane %v1071_v63, 2 }
 0x1b1   : > { %v1073_v37 = vadd.f32 %v1072_v18, %v1071_v63 }
 0x1b3   : > { %v1074_v26 = vrot.slane %v1073_v37, 1 }
 0x1b5   : > { %v1075_v33 = vadd.f32 %v1074_v26, %v1073_v37 }
 0x1b7   : > { %v1076_v34 = vmul.f32 0.015625, %v1075_v33  ;;  %1156 = vst.msk [vmem:[%s265_s8] sm:$0x1] %vm1155_vm13, %v1075_v33 }
 0x1b9   : > { %v1077_v8 = vsub.f32 %v1024_v45, %v1076_v34  ;;  %v1078_v36 = vsub.f32 %v1027_v32, %v1076_v34  ;;  %v1079_v29 = vsub.f32 %v1343_v30, %v1076_v34  ;;  %v1080_v50 = vsub.f32 %v1344_v52, %v1076_v34 }
 0x1ba   : > { %v1081_v54 = vsub.f32 %v1040_v3, %v1076_v34  ;;  %v1082_v41 = vsub.f32 %v1043_v1, %v1076_v34  ;;  %v1083_v31 = vsub.f32 %v1347_v44, %v1076_v34  ;;  %v1084_v35 = vsub.f32 %v1348_v14, %v1076_v34 }
 0x1bb   : > { %v1085_v47 = vmul.f32 %v1077_v8, %v1077_v8  ;;  %v1086_v48 = vmul.f32 %v1078_v36, %v1078_v36  ;;  %v1087_v49 = vmul.f32 %v1079_v29, %v1079_v29  ;;  %v1088_v12 = vmul.f32 %v1080_v50, %v1080_v50 }
 0x1bc   : > { %v1089_v59 = vmul.f32 %v1081_v54, %v1081_v54  ;;  %v1090_v10 = vmul.f32 %v1082_v41, %v1082_v41  ;;  %v1091_v51 = vmul.f32 %v1083_v31, %v1083_v31  ;;  %v1092_v42 = vmul.f32 %v1084_v35, %v1084_v35 }
 0x1bd   : > { %v1093_v38 = vsel %vm865_vm0, %v1085_v47, 0.0  ;;  %v1094_v6 = vsel %vm865_vm0, %v1086_v48, 0.0  ;;  %v1096_v46 = vsel %vm865_vm0, %v1087_v49, 0.0  ;;  %v1098_v25 = vsel %vm865_vm0, %v1088_v12, 0.0 }
 0x1be   : > { %v1095_v4 = vadd.f32 %v1094_v6, %v1093_v38  ;;  %v1100_v21 = vsel %vm865_vm0, %v1089_v59, 0.0  ;;  %v1102_v55 = vsel %vm865_vm0, %v1090_v10, 0.0  ;;  %v1104_v9 = vsel %vm865_vm0, %v1091_v51, 0.0 }
 0x1bf   : > { %v1106_v58 = vsel %vm865_vm0, %v1092_v42, 0.0 }
 0x1c0   : > { %v1097_v43 = vadd.f32 %v1096_v46, %v1095_v4 }
 0x1c2   : > { %v1099_v7 = vadd.f32 %v1098_v25, %v1097_v43 }
 0x1c4   : > { %v1101_v53 = vadd.f32 %v1100_v21, %v1099_v7 }
 0x1c6   : > { %v1103_v30 = vadd.f32 %v1102_v55, %v1101_v53 }
 0x1c8   : > { %v1105_v45 = vadd.f32 %v1104_v9, %v1103_v30 }
 0x1ca   : > { %v1107_v52 = vadd.f32 %v1106_v58, %v1105_v45 }
 0x1cc   : > { %v1108_v40 = vrot.slane %v1107_v52, 4 }
 0x1ce   : > { %v1109_v32 = vadd.f32 %v1108_v40, %v1107_v52 }
 0x1d0   : > { %v1110_v60 = vrot.slane %v1109_v32, 2 }
 0x1d2   : > { %v1111_v28 = vadd.f32 %v1110_v60, %v1109_v32 }
 0x1d4   : > { %v1112_v61 = vrot.slane %v1111_v28, 1 }
 0x1d6   : > { %v1113_v0 = vadd.f32 %v1112_v61, %v1111_v28 }
 0x1d8   : > { %1157 = vst.msk [vmem:[%s268_s11] sm:$0x1] %vm1155_vm13, %v1113_v0 }
 0x1d9 PF: > { %s17_s21 = sadd.s32 1, %s1389_s21  }
 0x1da   : > { %p14_p4 = scmp.ge.s32.totalorder %s17_s21, 4  }
 0x1dc   :  { %16 = sbr.rel (!%p14_p4) target bundleno = 1 (0x1), region = 90 }

</bundles_post_ra>
